<compile_context>
chip_gen: v6e
topology: v6e:2x2x1
jax: 0.10.0
libtpu: 0.0.40
codegen_flags: <defaults>
</compile_context>

<pallas_src>
import jax
import jax.numpy as jnp
from jax.experimental import pallas as pl
from jax.experimental.pallas import tpu as pltpu

INPUT_DIM = 128
HIDDEN_DIM = 256
NUM_HIDDEN_LAYERS = 3


def _cross_attention_kernel(
    a_ref, b_ref, c_ref,
    wkv_ref, bkv_ref, wq_ref, bq_ref, wc_ref, bc_ref,
    wh0_ref, bh0_ref, wh1_ref, bh1_ref, wh2_ref, bh2_ref,
    wf_ref, bf_ref,
    out_ref,
):
    BB, Sa, D = a_ref.shape
    _, Sb, _ = b_ref.shape
    _, M, _ = c_ref.shape
    H = wq_ref.shape[1]
    cd = wq_ref.dtype                     # matmul operand dtype (bf16)

    # Row-stack the batch for all projections (leading-dim collapse is layout free).
    a2 = a_ref[...].reshape(BB * Sa, D)
    b2 = b_ref[...].reshape(BB * Sb, D)
    c2 = c_ref[...].reshape(BB * M, D)

    # Fused key/value projection of A: one (D, 2H) weight push over BB*Sa rows.
    kv = jnp.dot(a2, wkv_ref[...], preferred_element_type=jnp.float32) + bkv_ref[...]
    keys = kv[:, :H].reshape(BB, Sa, H)          # 128-aligned lane slice
    values = kv[:, H:].reshape(BB, Sa, H)

    q = jnp.dot(b2, wq_ref[...], preferred_element_type=jnp.float32) + bq_ref[...]
    q = q.reshape(BB, Sb, H)

    # attention_scores = Q @ K^T per batch element (small; f32 accumulate).
    scores = jnp.einsum('bqh,bkh->bqk', q, keys,
                        preferred_element_type=jnp.float32)     # (BB, Sb, Sa)

    # softmax over the last axis; exact normalization, all f32 elementwise.
    m = jnp.max(scores, axis=-1, keepdims=True)
    e = jnp.exp(scores - m)
    attn = e / jnp.sum(e, axis=-1, keepdims=True)

    # sum_q(attn @ V) == (sum_q attn) @ V  ->  one (1,Sa)x(Sa,H) contraction / batch.
    attn_sum = jnp.sum(attn, axis=1, keepdims=True)             # (BB, 1, Sa)
    context = jnp.einsum('bqk,bkh->bqh', attn_sum, values,
                         preferred_element_type=jnp.float32)    # (BB, 1, H)

    # combined = context (broadcast over M rows) + c_projection(C)
    c_proj = jnp.dot(c2, wc_ref[...], preferred_element_type=jnp.float32) + bc_ref[...]
    h = (context + c_proj.reshape(BB, M, H)).reshape(BB * M, H)

    # hidden stack: [Linear -> ReLU -> Dropout] x 3, stacked over BB*M rows.
    # TODO(synk): Dropout(0.3) is stochastic in training; identity here (eval mode).
    for w_ref, bias_ref in ((wh0_ref, bh0_ref), (wh1_ref, bh1_ref), (wh2_ref, bh2_ref)):
        h = jnp.maximum(
            jnp.dot(h.astype(cd), w_ref[...],
                    preferred_element_type=jnp.float32) + bias_ref[...],
            0.0)

    # final fc (H -> 1), computed as wf_row (1,H) x h (BB*M,H)^T -> lane-dense (1, BB*M).
    out_row = jax.lax.dot_general(
        wf_ref[...], h.astype(cd), (((1,), (1,)), ((), ())),
        preferred_element_type=jnp.float32) + bf_ref[...]        # (1, BB*M)
    out_ref[...] = out_row[None]                                 # (1, 1, BB*M)


def pack_params(params, compute_dtype=jnp.bfloat16):
    """One-time weight packing: fuse K/V, pre-cast matmul operands to bf16.

    Biases stay f32 (they are added to f32 accumulators)."""
    wkv = jnp.concatenate([params["wk"], params["wv"]], axis=1).astype(compute_dtype)
    bkv = jnp.concatenate([params["bk"], params["bv"]], axis=1).astype(jnp.float32)

    def w(name):
        return params[name].astype(compute_dtype)

    def b(name):
        return params[name].astype(jnp.float32)

    return (
        wkv, bkv,
        w("wq"), b("bq"),
        w("wc"), b("bc"),
        w("wh0"), b("bh0"),
        w("wh1"), b("bh1"),
        w("wh2"), b("bh2"),
        w("wf"), b("bf"),
    )


def enhanced_cross_attention_batched(A, B, C, packed, *, block_batch=None):
    """Batched Pallas forward.

    A: (Bt, Sa, D)   B: (Bt, Sb, D)   C: (Bt, M, D)   ->   (Bt, M) float32
    """
    Bt, Sa, D = A.shape
    _, Sb, _ = B.shape
    _, M, _ = C.shape
    H = packed[2].shape[1]
    cd = packed[0].dtype

    if block_batch is None:
        # Largest divisor of Bt up to 128 elements per grid step: amortizes the
        # ~0.35 us/step grid overhead and stacks >= BB*M LHS rows per hidden-stack
        # matmul, while staying far inside scoped VMEM on v5e/v6e/v7x
        # (per-step activations ~BB*(Sa+Sb+M)*D*2 bytes + ~0.7 MB resident weights).
        block_batch = 1
        for bb in range(1, min(Bt, 128) + 1):
            if Bt % bb == 0:
                block_batch = bb
    if Bt % block_batch != 0:
        raise ValueError(f"batch {Bt} not divisible by block_batch {block_batch}")
    G = Bt // block_batch

    args = (A.astype(cd), B.astype(cd), C.astype(cd)) + tuple(packed)

    # Activations: BB batch elements per grid step.
    act_specs = [
        pl.BlockSpec((block_batch, Sa, D), lambda i: (i, 0, 0)),
        pl.BlockSpec((block_batch, Sb, D), lambda i: (i, 0, 0)),
        pl.BlockSpec((block_batch, M, D), lambda i: (i, 0, 0)),
    ]
    # Weights/biases: full-array blocks with a constant index_map -> DMA'd once and
    # VMEM-resident across all grid steps.
    weight_specs = [pl.BlockSpec(w.shape, lambda i: (0, 0)) for w in packed]

    out_spec = pl.BlockSpec((1, 1, block_batch * M), lambda i: (i, 0, 0))

    # Advisory cost estimate for the XLA scheduler.
    flops_per = (
        2 * Sa * D * (2 * H)                  # fused K/V projection
        + 2 * Sb * D * H                      # Q projection
        + 2 * Sb * Sa * H                     # Q @ K^T
        + 2 * Sa * H                          # (sum_q attn) @ V
        + 2 * M * D * H                       # C projection
        + NUM_HIDDEN_LAYERS * 2 * M * H * H   # hidden stack
        + 2 * M * H                           # final fc
    )
    weight_bytes = sum(int(w.size) * w.dtype.itemsize for w in packed)
    act_bytes = (A.size + B.size + C.size) * jnp.dtype(cd).itemsize + Bt * M * 4
    cost = pl.CostEstimate(
        flops=int(Bt * flops_per),
        transcendentals=int(Bt * Sb * Sa),
        bytes_accessed=int(weight_bytes + act_bytes),
    )

    out = pl.pallas_call(
        _cross_attention_kernel,
        out_shape=jax.ShapeDtypeStruct((G, 1, block_batch * M), jnp.float32),
        grid=(G,),
        in_specs=act_specs + weight_specs,
        out_specs=out_spec,
        compiler_params=pltpu.CompilerParams(
            dimension_semantics=("parallel",)),   # megacore sharding when G >= 2
        cost_estimate=cost,
    )(*args)
    return out.reshape(Bt, M)


def enhanced_cross_attention(A, B, C, packed):
    """Single-sample convenience wrapper.  A:(Sa,D)  B:(Sb,D)  C:(M,D) -> (M,)."""
    out = enhanced_cross_attention_batched(A[None], B[None], C[None], packed)
    return out[0]


def init_params(key, input_dim=INPUT_DIM, hidden_dim=HIDDEN_DIM):
    """Deterministic PyTorch-Linear-style init (U(-1/sqrt(fan_in), +1/sqrt(fan_in))).

    Weights are stored pre-transposed as (in_features, out_features); the kernel
    computes y = x @ W + b, numerically identical to PyTorch's x @ W.T + b."""
    def lin(k, fan_in, fan_out):
        k1, k2 = jax.random.split(k)
        lim = 1.0 / jnp.sqrt(jnp.float32(fan_in))
        w = jax.random.uniform(k1, (fan_in, fan_out), jnp.float32, -lim, lim)
        b = jax.random.uniform(k2, (1, fan_out), jnp.float32, -lim, lim)
        return w, b

    keys = jax.random.split(key, 8)
    params = {}
    params["wk"], params["bk"] = lin(keys[0], input_dim, hidden_dim)
    params["wq"], params["bq"] = lin(keys[1], input_dim, hidden_dim)
    params["wv"], params["bv"] = lin(keys[2], input_dim, hidden_dim)
    params["wc"], params["bc"] = lin(keys[3], input_dim, hidden_dim)
    params["wh0"], params["bh0"] = lin(keys[4], hidden_dim, hidden_dim)
    params["wh1"], params["bh1"] = lin(keys[5], hidden_dim, hidden_dim)
    params["wh2"], params["bh2"] = lin(keys[6], hidden_dim, hidden_dim)
    wf, bf = lin(keys[7], hidden_dim, 1)          # fc: (hidden, 1), bias (1, 1)
    params["wf"] = wf.T                           # stored as (1, hidden) row
    params["bf"] = bf                             # (1, 1)
    return params


def reference_forward(A, B, C, p):
    """Pure-JAX f32 reference mirroring the PyTorch module (eval mode)."""
    keys = A @ p["wk"] + p["bk"]
    queries = B @ p["wq"] + p["bq"]
    values = A @ p["wv"] + p["bv"]
    scores = queries @ keys.T
    attn = jax.nn.softmax(scores, axis=-1)
    context = attn @ values
    context = jnp.sum(context, axis=0)
    combined = context + (C @ p["wc"] + p["bc"])
    for w, b in ((p["wh0"], p["bh0"]), (p["wh1"], p["bh1"]), (p["wh2"], p["bh2"])):
        combined = jnp.maximum(combined @ w + b, 0.0)
    out = combined @ p["wf"].T + p["bf"]
    return out[:, 0]


if __name__ == "__main__":
    key = jax.random.PRNGKey(0)
    ka, kb, kc, kp = jax.random.split(key, 4)

    Bt, Sa, Sb, M = 4, 16, 8, 8
    A = jax.random.normal(ka, (Bt, Sa, INPUT_DIM), jnp.float32)
    B = jax.random.normal(kb, (Bt, Sb, INPUT_DIM), jnp.float32)
    C = jax.random.normal(kc, (Bt, M, INPUT_DIM), jnp.float32)
    params = init_params(kp)
    packed = pack_params(params)                  # bf16 matmul weights, f32 biases

    # Whole batch in one grid step (BB=4, grid=(1,)).
    out = enhanced_cross_attention_batched(A, B, C, packed)
    jax.block_until_ready(out)

    ref = jax.vmap(lambda a, b, c: reference_forward(a, b, c, params))(A, B, C)
    assert out.shape == (Bt, M), out.shape
    # Tolerance accounts for bf16 MXU operands (f32 accumulation, f32 reference).
    assert jnp.allclose(out, ref, atol=5e-2, rtol=5e-2), (out, ref)

    # Multi-block grid path (BB=2 -> grid=(2,), exercises megacore sharding).
    out2 = enhanced_cross_attention_batched(A, B, C, packed, block_batch=2)
    jax.block_until_ready(out2)
    assert jnp.allclose(out2, ref, atol=5e-2, rtol=5e-2)

    # Single-sample path (same kernel, batch of 1).
    out1 = enhanced_cross_attention(A[0], B[0], C[0], packed)
    jax.block_until_ready(out1)
    assert out1.shape == (M,)
    assert jnp.allclose(out1, ref[0], atol=5e-2, rtol=5e-2)

    print("KERNEL_OK")
</pallas_src>

<mosaic_0001>
module attributes {stable_mosaic.version = 11 : i64} {
  func.func @_cross_attention_kernel(%arg0: i32, %arg1: memref<4x16x128xbf16, #tpu.memory_space<vmem>>, %arg2: memref<4x8x128xbf16, #tpu.memory_space<vmem>>, %arg3: memref<4x8x128xbf16, #tpu.memory_space<vmem>>, %arg4: memref<128x512xbf16, #tpu.memory_space<vmem>>, %arg5: memref<1x512xf32, #tpu.memory_space<vmem>>, %arg6: memref<128x256xbf16, #tpu.memory_space<vmem>>, %arg7: memref<1x256xf32, #tpu.memory_space<vmem>>, %arg8: memref<128x256xbf16, #tpu.memory_space<vmem>>, %arg9: memref<1x256xf32, #tpu.memory_space<vmem>>, %arg10: memref<256x256xbf16, #tpu.memory_space<vmem>>, %arg11: memref<1x256xf32, #tpu.memory_space<vmem>>, %arg12: memref<256x256xbf16, #tpu.memory_space<vmem>>, %arg13: memref<1x256xf32, #tpu.memory_space<vmem>>, %arg14: memref<256x256xbf16, #tpu.memory_space<vmem>>, %arg15: memref<1x256xf32, #tpu.memory_space<vmem>>, %arg16: memref<1x256xbf16, #tpu.memory_space<vmem>>, %arg17: memref<1x1xf32, #tpu.memory_space<vmem>>, %arg18: memref<1x1x32xf32, #tpu.memory_space<vmem>>) attributes {dimension_semantics = [#tpu.dimension_semantics<parallel>], iteration_bounds = array<i64: 1>, scalar_prefetch = 0 : i64, scratch_operands = 0 : i64, tpu.core_type = #tpu.core_type<tc>, window_params = [{transform_indices = @transform_0, window_bounds = array<i64: 4, 16, 128>}, {transform_indices = @transform_1, window_bounds = array<i64: 4, 8, 128>}, {transform_indices = @transform_2, window_bounds = array<i64: 4, 8, 128>}, {pipeline_mode = #tpu.pipeline_mode<synchronous>, transform_indices = @transform_3, window_bounds = array<i64: 128, 512>}, {pipeline_mode = #tpu.pipeline_mode<synchronous>, transform_indices = @transform_4, window_bounds = array<i64: 1, 512>}, {pipeline_mode = #tpu.pipeline_mode<synchronous>, transform_indices = @transform_5, window_bounds = array<i64: 128, 256>}, {pipeline_mode = #tpu.pipeline_mode<synchronous>, transform_indices = @transform_6, window_bounds = array<i64: 1, 256>}, {pipeline_mode = #tpu.pipeline_mode<synchronous>, transform_indices = @transform_7, window_bounds = array<i64: 128, 256>}, {pipeline_mode = #tpu.pipeline_mode<synchronous>, transform_indices = @transform_8, window_bounds = array<i64: 1, 256>}, {pipeline_mode = #tpu.pipeline_mode<synchronous>, transform_indices = @transform_9, window_bounds = array<i64: 256, 256>}, {pipeline_mode = #tpu.pipeline_mode<synchronous>, transform_indices = @transform_10, window_bounds = array<i64: 1, 256>}, {pipeline_mode = #tpu.pipeline_mode<synchronous>, transform_indices = @transform_11, window_bounds = array<i64: 256, 256>}, {pipeline_mode = #tpu.pipeline_mode<synchronous>, transform_indices = @transform_12, window_bounds = array<i64: 1, 256>}, {pipeline_mode = #tpu.pipeline_mode<synchronous>, transform_indices = @transform_13, window_bounds = array<i64: 256, 256>}, {pipeline_mode = #tpu.pipeline_mode<synchronous>, transform_indices = @transform_14, window_bounds = array<i64: 1, 256>}, {pipeline_mode = #tpu.pipeline_mode<synchronous>, transform_indices = @transform_15, window_bounds = array<i64: 1, 256>}, {pipeline_mode = #tpu.pipeline_mode<synchronous>, transform_indices = @transform_16, window_bounds = array<i64: 1, 1>}, {transform_indices = @transform_17, window_bounds = array<i64: 1, 1, 32>}]} {
    %c0 = arith.constant 0 : index
    %c0_0 = arith.constant 0 : index
    %c0_1 = arith.constant 0 : index
    %0 = vector.load %arg1[%c0, %c0_0, %c0_1] : memref<4x16x128xbf16, #tpu.memory_space<vmem>>, vector<4x16x128xbf16>
    %1 = vector.shape_cast %0 : vector<4x16x128xbf16> to vector<64x128xbf16>
    %c0_2 = arith.constant 0 : index
    %c0_3 = arith.constant 0 : index
    %c0_4 = arith.constant 0 : index
    %2 = vector.load %arg2[%c0_2, %c0_3, %c0_4] : memref<4x8x128xbf16, #tpu.memory_space<vmem>>, vector<4x8x128xbf16>
    %3 = vector.shape_cast %2 : vector<4x8x128xbf16> to vector<32x128xbf16>
    %c0_5 = arith.constant 0 : index
    %c0_6 = arith.constant 0 : index
    %c0_7 = arith.constant 0 : index
    %4 = vector.load %arg3[%c0_5, %c0_6, %c0_7] : memref<4x8x128xbf16, #tpu.memory_space<vmem>>, vector<4x8x128xbf16>
    %5 = vector.shape_cast %4 : vector<4x8x128xbf16> to vector<32x128xbf16>
    %c0_8 = arith.constant 0 : index
    %c0_9 = arith.constant 0 : index
    %6 = vector.load %arg4[%c0_8, %c0_9] : memref<128x512xbf16, #tpu.memory_space<vmem>>, vector<128x512xbf16>
    %cst = arith.constant dense<0.000000e+00> : vector<64x512xf32>
    %7 = tpu.matmul %1, %6, %cst {dimension_numbers = #tpu.dot_dimension_numbers<[1], [0], [0], [1], [0, 0, 1, 1], [], []>} : vector<64x128xbf16>, vector<128x512xbf16>, vector<64x512xf32> -> vector<64x512xf32>
    %c0_10 = arith.constant 0 : index
    %c0_11 = arith.constant 0 : index
    %8 = vector.load %arg5[%c0_10, %c0_11] : memref<1x512xf32, #tpu.memory_space<vmem>>, vector<1x512xf32>
    %9 = vector.broadcast %8 : vector<1x512xf32> to vector<64x512xf32>
    %10 = arith.addf %7, %9 : vector<64x512xf32>
    %11 = vector.extract_strided_slice %10 {offsets = [0, 0], sizes = [64, 256], strides = [1, 1]} : vector<64x512xf32> to vector<64x256xf32>
    %12 = vector.shape_cast %11 : vector<64x256xf32> to vector<4x16x256xf32>
    %13 = vector.extract_strided_slice %10 {offsets = [0, 256], sizes = [64, 256], strides = [1, 1]} : vector<64x512xf32> to vector<64x256xf32>
    %14 = vector.shape_cast %13 : vector<64x256xf32> to vector<4x16x256xf32>
    %c0_12 = arith.constant 0 : index
    %c0_13 = arith.constant 0 : index
    %15 = vector.load %arg6[%c0_12, %c0_13] : memref<128x256xbf16, #tpu.memory_space<vmem>>, vector<128x256xbf16>
    %cst_14 = arith.constant dense<0.000000e+00> : vector<32x256xf32>
    %16 = tpu.matmul %3, %15, %cst_14 {dimension_numbers = #tpu.dot_dimension_numbers<[1], [0], [0], [1], [0, 0, 1, 1], [], []>} : vector<32x128xbf16>, vector<128x256xbf16>, vector<32x256xf32> -> vector<32x256xf32>
    %c0_15 = arith.constant 0 : index
    %c0_16 = arith.constant 0 : index
    %17 = vector.load %arg7[%c0_15, %c0_16] : memref<1x256xf32, #tpu.memory_space<vmem>>, vector<1x256xf32>
    %18 = vector.broadcast %17 : vector<1x256xf32> to vector<32x256xf32>
    %19 = arith.addf %16, %18 : vector<32x256xf32>
    %20 = vector.shape_cast %19 : vector<32x256xf32> to vector<4x8x256xf32>
    "tpu.trace_start"() <{level = 10 : i32, message = "bqh,bkh->bqk"}> : () -> ()
    %cst_17 = arith.constant dense<0.000000e+00> : vector<4x8x16xf32>
    %21 = tpu.matmul %20, %12, %cst_17 {dimension_numbers = #tpu.dot_dimension_numbers<[2], [2], [1], [1], [0, 0, 0, 1, 1, 1], [0], [0]>} : vector<4x8x256xf32>, vector<4x16x256xf32>, vector<4x8x16xf32> -> vector<4x8x16xf32>
    "tpu.trace_stop"() : () -> ()
    %cst_18 = arith.constant dense<0xFF800000> : vector<4x8xf32>
    %22 = vector.multi_reduction <maximumf>, %21, %cst_18 [2] : vector<4x8x16xf32> to vector<4x8xf32>
    %23 = vector.shape_cast %22 : vector<4x8xf32> to vector<4x8x1xf32>
    %24 = vector.broadcast %23 : vector<4x8x1xf32> to vector<4x8x16xf32>
    %25 = arith.subf %21, %24 : vector<4x8x16xf32>
    %26 = math.exp %25 : vector<4x8x16xf32>
    %cst_19 = arith.constant dense<0.000000e+00> : vector<4x8xf32>
    %27 = vector.multi_reduction <add>, %26, %cst_19 [2] : vector<4x8x16xf32> to vector<4x8xf32>
    %28 = vector.shape_cast %27 : vector<4x8xf32> to vector<4x8x1xf32>
    %29 = vector.broadcast %28 : vector<4x8x1xf32> to vector<4x8x16xf32>
    %30 = arith.divf %26, %29 : vector<4x8x16xf32>
    %cst_20 = arith.constant dense<0.000000e+00> : vector<4x16xf32>
    %31 = vector.multi_reduction <add>, %30, %cst_20 [1] : vector<4x8x16xf32> to vector<4x16xf32>
    %32 = vector.shape_cast %31 : vector<4x16xf32> to vector<4x1x16xf32>
    "tpu.trace_start"() <{level = 10 : i32, message = "bqk,bkh->bqh"}> : () -> ()
    %cst_21 = arith.constant dense<0.000000e+00> : vector<4x1x256xf32>
    %33 = tpu.matmul %32, %14, %cst_21 {dimension_numbers = #tpu.dot_dimension_numbers<[2], [1], [1], [2], [0, 0, 0, 1, 1, 2], [0], [0]>} : vector<4x1x16xf32>, vector<4x16x256xf32>, vector<4x1x256xf32> -> vector<4x1x256xf32>
    "tpu.trace_stop"() : () -> ()
    %c0_22 = arith.constant 0 : index
    %c0_23 = arith.constant 0 : index
    %34 = vector.load %arg8[%c0_22, %c0_23] : memref<128x256xbf16, #tpu.memory_space<vmem>>, vector<128x256xbf16>
    %cst_24 = arith.constant dense<0.000000e+00> : vector<32x256xf32>
    %35 = tpu.matmul %5, %34, %cst_24 {dimension_numbers = #tpu.dot_dimension_numbers<[1], [0], [0], [1], [0, 0, 1, 1], [], []>} : vector<32x128xbf16>, vector<128x256xbf16>, vector<32x256xf32> -> vector<32x256xf32>
    %c0_25 = arith.constant 0 : index
    %c0_26 = arith.constant 0 : index
    %36 = vector.load %arg9[%c0_25, %c0_26] : memref<1x256xf32, #tpu.memory_space<vmem>>, vector<1x256xf32>
    %37 = vector.broadcast %36 : vector<1x256xf32> to vector<32x256xf32>
    %38 = arith.addf %35, %37 : vector<32x256xf32>
    %39 = vector.shape_cast %38 : vector<32x256xf32> to vector<4x8x256xf32>
    %40 = vector.broadcast %33 : vector<4x1x256xf32> to vector<4x8x256xf32>
    %41 = arith.addf %40, %39 : vector<4x8x256xf32>
    %42 = vector.shape_cast %41 : vector<4x8x256xf32> to vector<32x256xf32>
    %43 = arith.truncf %42 : vector<32x256xf32> to vector<32x256xbf16>
    %c0_27 = arith.constant 0 : index
    %c0_28 = arith.constant 0 : index
    %44 = vector.load %arg10[%c0_27, %c0_28] : memref<256x256xbf16, #tpu.memory_space<vmem>>, vector<256x256xbf16>
    %cst_29 = arith.constant dense<0.000000e+00> : vector<32x256xf32>
    %45 = tpu.matmul %43, %44, %cst_29 {dimension_numbers = #tpu.dot_dimension_numbers<[1], [0], [0], [1], [0, 0, 1, 1], [], []>} : vector<32x256xbf16>, vector<256x256xbf16>, vector<32x256xf32> -> vector<32x256xf32>
    %c0_30 = arith.constant 0 : index
    %c0_31 = arith.constant 0 : index
    %46 = vector.load %arg11[%c0_30, %c0_31] : memref<1x256xf32, #tpu.memory_space<vmem>>, vector<1x256xf32>
    %47 = vector.broadcast %46 : vector<1x256xf32> to vector<32x256xf32>
    %48 = arith.addf %45, %47 : vector<32x256xf32>
    %cst_32 = arith.constant 0.000000e+00 : f32
    %49 = vector.broadcast %cst_32 : f32 to vector<32x256xf32>
    %50 = arith.maximumf %48, %49 : vector<32x256xf32>
    %51 = arith.truncf %50 : vector<32x256xf32> to vector<32x256xbf16>
    %c0_33 = arith.constant 0 : index
    %c0_34 = arith.constant 0 : index
    %52 = vector.load %arg12[%c0_33, %c0_34] : memref<256x256xbf16, #tpu.memory_space<vmem>>, vector<256x256xbf16>
    %cst_35 = arith.constant dense<0.000000e+00> : vector<32x256xf32>
    %53 = tpu.matmul %51, %52, %cst_35 {dimension_numbers = #tpu.dot_dimension_numbers<[1], [0], [0], [1], [0, 0, 1, 1], [], []>} : vector<32x256xbf16>, vector<256x256xbf16>, vector<32x256xf32> -> vector<32x256xf32>
    %c0_36 = arith.constant 0 : index
    %c0_37 = arith.constant 0 : index
    %54 = vector.load %arg13[%c0_36, %c0_37] : memref<1x256xf32, #tpu.memory_space<vmem>>, vector<1x256xf32>
    %55 = vector.broadcast %54 : vector<1x256xf32> to vector<32x256xf32>
    %56 = arith.addf %53, %55 : vector<32x256xf32>
    %cst_38 = arith.constant 0.000000e+00 : f32
    %57 = vector.broadcast %cst_38 : f32 to vector<32x256xf32>
    %58 = arith.maximumf %56, %57 : vector<32x256xf32>
    %59 = arith.truncf %58 : vector<32x256xf32> to vector<32x256xbf16>
    %c0_39 = arith.constant 0 : index
    %c0_40 = arith.constant 0 : index
    %60 = vector.load %arg14[%c0_39, %c0_40] : memref<256x256xbf16, #tpu.memory_space<vmem>>, vector<256x256xbf16>
    %cst_41 = arith.constant dense<0.000000e+00> : vector<32x256xf32>
    %61 = tpu.matmul %59, %60, %cst_41 {dimension_numbers = #tpu.dot_dimension_numbers<[1], [0], [0], [1], [0, 0, 1, 1], [], []>} : vector<32x256xbf16>, vector<256x256xbf16>, vector<32x256xf32> -> vector<32x256xf32>
    %c0_42 = arith.constant 0 : index
    %c0_43 = arith.constant 0 : index
    %62 = vector.load %arg15[%c0_42, %c0_43] : memref<1x256xf32, #tpu.memory_space<vmem>>, vector<1x256xf32>
    %63 = vector.broadcast %62 : vector<1x256xf32> to vector<32x256xf32>
    %64 = arith.addf %61, %63 : vector<32x256xf32>
    %cst_44 = arith.constant 0.000000e+00 : f32
    %65 = vector.broadcast %cst_44 : f32 to vector<32x256xf32>
    %66 = arith.maximumf %64, %65 : vector<32x256xf32>
    %c0_45 = arith.constant 0 : index
    %c0_46 = arith.constant 0 : index
    %67 = vector.load %arg16[%c0_45, %c0_46] : memref<1x256xbf16, #tpu.memory_space<vmem>>, vector<1x256xbf16>
    %68 = arith.truncf %66 : vector<32x256xf32> to vector<32x256xbf16>
    %cst_47 = arith.constant dense<0.000000e+00> : vector<1x32xf32>
    %69 = tpu.matmul %67, %68, %cst_47 {dimension_numbers = #tpu.dot_dimension_numbers<[1], [1], [0], [0], [0, 0, 1, 0], [], []>} : vector<1x256xbf16>, vector<32x256xbf16>, vector<1x32xf32> -> vector<1x32xf32>
    %c0_48 = arith.constant 0 : index
    %c0_49 = arith.constant 0 : index
    %70 = vector.load %arg17[%c0_48, %c0_49] : memref<1x1xf32, #tpu.memory_space<vmem>>, vector<1x1xf32>
    %71 = vector.broadcast %70 : vector<1x1xf32> to vector<1x32xf32>
    %72 = arith.addf %69, %71 : vector<1x32xf32>
    %73 = vector.shape_cast %72 : vector<1x32xf32> to vector<1x1x32xf32>
    %c0_50 = arith.constant 0 : index
    %c0_51 = arith.constant 0 : index
    %c0_52 = arith.constant 0 : index
    %74 = vector.load %arg18[%c0_50, %c0_51, %c0_52] : memref<1x1x32xf32, #tpu.memory_space<vmem>>, vector<1x1x32xf32>
    tpu.vector_store %arg18[%c0_50, %c0_51, %c0_52], %73 {strides = array<i32>} : memref<1x1x32xf32, #tpu.memory_space<vmem>>, vector<1x1x32xf32>,
    return
  }
  func.func @transform_0(%arg0: i32) -> (i32, i32, i32) {
    %c0_i32 = arith.constant 0 : i32
    %c0_i32_0 = arith.constant 0 : i32
    %c0_i32_1 = arith.constant 0 : i32
    return %arg0, %c0_i32, %c0_i32_0 : i32, i32, i32
  }
  func.func @transform_1(%arg0: i32) -> (i32, i32, i32) {
    %c0_i32 = arith.constant 0 : i32
    %c0_i32_0 = arith.constant 0 : i32
    %c0_i32_1 = arith.constant 0 : i32
    return %arg0, %c0_i32, %c0_i32_0 : i32, i32, i32
  }
  func.func @transform_2(%arg0: i32) -> (i32, i32, i32) {
    %c0_i32 = arith.constant 0 : i32
    %c0_i32_0 = arith.constant 0 : i32
    %c0_i32_1 = arith.constant 0 : i32
    return %arg0, %c0_i32, %c0_i32_0 : i32, i32, i32
  }
  func.func @transform_3(%arg0: i32) -> (i32, i32) {
    %c0_i32 = arith.constant 0 : i32
    %c0_i32_0 = arith.constant 0 : i32
    %c0_i32_1 = arith.constant 0 : i32
    return %c0_i32, %c0_i32_0 : i32, i32
  }
  func.func @transform_4(%arg0: i32) -> (i32, i32) {
    %c0_i32 = arith.constant 0 : i32
    %c0_i32_0 = arith.constant 0 : i32
    %c0_i32_1 = arith.constant 0 : i32
    return %c0_i32, %c0_i32_0 : i32, i32
  }
  func.func @transform_5(%arg0: i32) -> (i32, i32) {
    %c0_i32 = arith.constant 0 : i32
    %c0_i32_0 = arith.constant 0 : i32
    %c0_i32_1 = arith.constant 0 : i32
    return %c0_i32, %c0_i32_0 : i32, i32
  }
  func.func @transform_6(%arg0: i32) -> (i32, i32) {
    %c0_i32 = arith.constant 0 : i32
    %c0_i32_0 = arith.constant 0 : i32
    %c0_i32_1 = arith.constant 0 : i32
    return %c0_i32, %c0_i32_0 : i32, i32
  }
  func.func @transform_7(%arg0: i32) -> (i32, i32) {
    %c0_i32 = arith.constant 0 : i32
    %c0_i32_0 = arith.constant 0 : i32
    %c0_i32_1 = arith.constant 0 : i32
    return %c0_i32, %c0_i32_0 : i32, i32
  }
  func.func @transform_8(%arg0: i32) -> (i32, i32) {
    %c0_i32 = arith.constant 0 : i32
    %c0_i32_0 = arith.constant 0 : i32
    %c0_i32_1 = arith.constant 0 : i32
    return %c0_i32, %c0_i32_0 : i32, i32
  }
  func.func @transform_9(%arg0: i32) -> (i32, i32) {
    %c0_i32 = arith.constant 0 : i32
    %c0_i32_0 = arith.constant 0 : i32
    %c0_i32_1 = arith.constant 0 : i32
    return %c0_i32, %c0_i32_0 : i32, i32
  }
  func.func @transform_10(%arg0: i32) -> (i32, i32) {
    %c0_i32 = arith.constant 0 : i32
    %c0_i32_0 = arith.constant 0 : i32
    %c0_i32_1 = arith.constant 0 : i32
    return %c0_i32, %c0_i32_0 : i32, i32
  }
  func.func @transform_11(%arg0: i32) -> (i32, i32) {
    %c0_i32 = arith.constant 0 : i32
    %c0_i32_0 = arith.constant 0 : i32
    %c0_i32_1 = arith.constant 0 : i32
    return %c0_i32, %c0_i32_0 : i32, i32
  }
  func.func @transform_12(%arg0: i32) -> (i32, i32) {
    %c0_i32 = arith.constant 0 : i32
    %c0_i32_0 = arith.constant 0 : i32
    %c0_i32_1 = arith.constant 0 : i32
    return %c0_i32, %c0_i32_0 : i32, i32
  }
  func.func @transform_13(%arg0: i32) -> (i32, i32) {
    %c0_i32 = arith.constant 0 : i32
    %c0_i32_0 = arith.constant 0 : i32
    %c0_i32_1 = arith.constant 0 : i32
    return %c0_i32, %c0_i32_0 : i32, i32
  }
  func.func @transform_14(%arg0: i32) -> (i32, i32) {
    %c0_i32 = arith.constant 0 : i32
    %c0_i32_0 = arith.constant 0 : i32
    %c0_i32_1 = arith.constant 0 : i32
    return %c0_i32, %c0_i32_0 : i32, i32
  }
  func.func @transform_15(%arg0: i32) -> (i32, i32) {
    %c0_i32 = arith.constant 0 : i32
    %c0_i32_0 = arith.constant 0 : i32
    %c0_i32_1 = arith.constant 0 : i32
    return %c0_i32, %c0_i32_0 : i32, i32
  }
  func.func @transform_16(%arg0: i32) -> (i32, i32) {
    %c0_i32 = arith.constant 0 : i32
    %c0_i32_0 = arith.constant 0 : i32
    %c0_i32_1 = arith.constant 0 : i32
    return %c0_i32, %c0_i32_0 : i32, i32
  }
  func.func @transform_17(%arg0: i32) -> (i32, i32, i32) {
    %c0_i32 = arith.constant 0 : i32
    %c0_i32_0 = arith.constant 0 : i32
    %c0_i32_1 = arith.constant 0 : i32
    return %arg0, %c0_i32, %c0_i32_0 : i32, i32, i32
  }
}

</mosaic_0001>

<bundles_post_ra>
// kernel: tpu_custom_call.1
= control target key start
LH: loop header
LB: loop body
LE: loop exit
PB: predicated region body
PF: predicated region fallthrough
CT: control target
= control target key end

     0   :  { %s3483_s0 = inlined_call_operand.hbm [shape: bf16[4,16,128], index: 0, kind: input, shape index: {}]   ;;  %s3484_s1 = inlined_call_operand.hbm [shape: bf16[4,8,128], index: 1, kind: input, shape index: {}]   ;;  %s3485_s2 = inlined_call_operand.hbm [shape: bf16[4,8,128], index: 2, kind: input, shape index: {}]   ;;  %s3486_s3 = inlined_call_operand.hbm [shape: bf16[128,512], index: 3, kind: input, shape index: {}]   ;;  %s3487_s4 = inlined_call_operand.vmem [shape: f32[1,512], index: 4, kind: input, shape index: {}]   ;;  %s3488_s5 = inlined_call_operand.hbm [shape: bf16[128,256], index: 5, kind: input, shape index: {}]   ;;  %s3489_s6 = inlined_call_operand.vmem [shape: f32[1,256], index: 6, kind: input, shape index: {}]   ;;  %s3490_s7 = inlined_call_operand.hbm [shape: bf16[128,256], index: 7, kind: input, shape index: {}]   ;;  %s3491_s8 = inlined_call_operand.vmem [shape: f32[1,256], index: 8, kind: input, shape index: {}]   ;;  %s3492_s9 = inlined_call_operand.hbm [shape: bf16[256,256], index: 9, kind: input, shape index: {}]   ;;  %s3493_s10 = inlined_call_operand.vmem [shape: f32[1,256], index: 10, kind: input, shape index: {}]   ;;  %s3494_s11 = inlined_call_operand.hbm [shape: bf16[256,256], index: 11, kind: input, shape index: {}]   ;;  %s3495_s12 = inlined_call_operand.vmem [shape: f32[1,256], index: 12, kind: input, shape index: {}]   ;;  %s3496_s13 = inlined_call_operand.hbm [shape: bf16[256,256], index: 13, kind: input, shape index: {}]   ;;  %s3497_s14 = inlined_call_operand.vmem [shape: f32[1,256], index: 14, kind: input, shape index: {}]   ;;  %s3498_s15 = inlined_call_operand.vmem [shape: bf16[1,256], index: 15, kind: input, shape index: {}]   ;;  %s3499_s16 = inlined_call_operand.<no memory space> [shape: f32[1,1], index: 16, kind: input, shape index: {}]   ;;  %s3500_s17 = inlined_call_operand.hbm [shape: f32[1,1,32], index: 17, kind: output, shape index: {}]  }
   0x1   :  { %3501 = sst [smem:[#allocation25_spill]] %s3483_s0  ;;  %v22_v0 = vstv %s3499_s16 }
   0x2   :  { %3502 = sst [smem:[#allocation26_spill]] %s3484_s1  ;;  %23 = vst [vmem:[#allocation2] sm:$0x1] %v22_v0 }
   0x3   :  { %24 = vsyncpa [#allocation4], 0 }
   0x4   :  { %25 = vsyncpa [#allocation7], 0 }
   0x5   :  { %26 = vsyncpa [#allocation10], 0 }
   0x6   :  { %27 = vsyncpa [#allocation13], 0 }
   0x7   :  { %28 = vsyncpa [#allocation16], 0 }
   0x8   :  { %29 = vsyncpa [#allocation5], 0  ;;  %s3194_s26 = smov [#allocation6]   ;;  %s3195_s28 = smov [#allocation9]  }
   0x9   :  { %s47_s27 = sshll.u32 %s3194_s26, 4  ;;  %s71_s29 = sshll.u32 %s3195_s28, 4  ;;  %s48_s27 = int_to_ptr.vmem [resolvable:$true] %s47_s27  ;;  %s72_s29 = int_to_ptr.vmem [resolvable:$true] %s71_s29 }
   0xa   :  { %s2990_s0 = scalar_lea.vmem %s48_s27, 256  ;;  %p2995_p1 = scmp.lt.s32.totalorder %s48_s27, %s48_s27 }
   0xb   :  { %p2991_p0 = scmp.ne.s32.totalorder %s48_s27, %s2990_s0  ;;  %p2996_p2 = scmp.lt.s32.totalorder %s2990_s0, %s2990_s0 }
   0xd   :  { %p2997_p3 = por %p2996_p2, %p2995_p1 }
   0xf   :  { %p2998_p4 = pnand %p2997_p3, %p2991_p0 }
  0x11   :  { %3001 = shalt.err (!%p2998_p4)
}
  0x12   :  { %s3196_s16 = smov 64   ;;  %s3197_s30 = smov 4  }
  0x13   :  { %s3503_s1 = sld [smem:[#allocation26_spill]]  ;;  %s3010_s20 = scalar_lea.vmem %s72_s29, 4096 }
  0x14   :  { %p3011_p5 = scmp.ne.s32.totalorder %s72_s29, %s3010_s20  ;;  %p3015_p6 = scmp.lt.s32.totalorder %s72_s29, %s72_s29 }
  0x15   :  { %p3016_p7 = scmp.lt.s32.totalorder %s3010_s20, %s3010_s20 }
  0x17   :  { %p3017_p8 = por %p3016_p7, %p3015_p6 }
  0x19   :  { %53 = dma.hbm_to_vmem [thread:$0]  %s3503_s1, 256, %s48_s27, [#allocation7], %s3196_s16, %s3196_s16, %s3197_s30  }
  0x1a   :  { %p3018_p9 = pnand %p3017_p8, %p3011_p5 }
  0x1c   :  { %3021 = shalt.err (!%p3018_p9)
}
  0x1d   :  { %s3198_s21 = smov 256   ;;  %s3199_s22 = smov 16  }
  0x1e   :  { %77 = dma.hbm_to_vmem [thread:$0]  %s3486_s3, 4096, %s72_s29, [#allocation10], %s3198_s21, %s3198_s21, %s3199_s22  }
  0x1f   :  { %s3200_s25 = smov [#allocation12]   ;;  %s3201_s28 = smov [#allocation15]  }
  0x20   :  { %s99_s26 = sshll.u32 %s3200_s25, 4  ;;  %s127_s0 = sshll.u32 %s3201_s28, 4  ;;  %s100_s26 = int_to_ptr.vmem [resolvable:$true] %s99_s26  ;;  %s128_s0 = int_to_ptr.vmem [resolvable:$true] %s127_s0 }
  0x21   :  { %s3030_s27 = scalar_lea.vmem %s100_s26, 2048  ;;  %p3035_p11 = scmp.lt.s32.totalorder %s100_s26, %s100_s26 }
  0x22   :  { %p3031_p10 = scmp.ne.s32.totalorder %s100_s26, %s3030_s27  ;;  %p3036_p12 = scmp.lt.s32.totalorder %s3030_s27, %s3030_s27 }
  0x24   :  { %p3037_p13 = por %p3036_p12, %p3035_p11 }
  0x26   :  { %p3038_p0 = pnand %p3037_p13, %p3031_p10 }
  0x28   :  { %3041 = shalt.err (!%p3038_p0)
}
  0x29   :  { %s3202_s18 = smov 128   ;;  %s3203_s19 = smov 8  }
  0x2a   :  { %105 = dma.hbm_to_vmem [thread:$0]  %s3490_s7, 2048, %s100_s26, [#allocation13], %s3202_s18, %s3202_s18, %s3203_s19  }
  0x2b   :  { %s3050_s29 = scalar_lea.vmem %s128_s0, 4096  ;;  %p3055_p2 = scmp.lt.s32.totalorder %s128_s0, %s128_s0 }
  0x2c   :  { %p3051_p1 = scmp.ne.s32.totalorder %s128_s0, %s3050_s29  ;;  %p3056_p3 = scmp.lt.s32.totalorder %s3050_s29, %s3050_s29 }
  0x2e   :  { %p3057_p4 = por %p3056_p3, %p3055_p2 }
  0x30   :  { %p3058_p5 = pnand %p3057_p4, %p3051_p1 }
  0x32   :  { %3061 = shalt.err (!%p3058_p5)
}
  0x33   :  { %133 = dma.hbm_to_vmem [thread:$0]  %s3494_s11, 4096, %s128_s0, [#allocation16], %s3202_s18, %s3202_s18, %s3203_s19  }
  0x34   :  { %s3204_s22 = smov [#allocation3]   ;;  %s3205_s24 = smov [#allocation8]  }
  0x35   :  { %s35_s23 = sshll.u32 %s3204_s22, 4  ;;  %s59_s25 = sshll.u32 %s3205_s24, 4  ;;  %s36_s23 = int_to_ptr.vmem [resolvable:$true] %s35_s23  ;;  %s60_s25 = int_to_ptr.vmem [resolvable:$true] %s59_s25 }
  0x36   :  { %s3070_s7 = scalar_lea.vmem %s36_s23, 512  ;;  %p3075_p7 = scmp.lt.s32.totalorder %s36_s23, %s36_s23 }
  0x37   :  { %p3071_p6 = scmp.ne.s32.totalorder %s36_s23, %s3070_s7  ;;  %p3076_p8 = scmp.lt.s32.totalorder %s3070_s7, %s3070_s7 }
  0x39   :  { %p3077_p9 = por %p3076_p8, %p3075_p7 }
  0x3b   :  { %p3078_p10 = pnand %p3077_p9, %p3071_p6 }
  0x3d   :  { %3081 = shalt.err (!%p3078_p10)
}
  0x3e   :  { %s3504_s27 = sld [smem:[#allocation25_spill]]  ;;  %s3090_s11 = scalar_lea.vmem %s60_s25, 256 }
  0x3f   :  { %p3091_p11 = scmp.ne.s32.totalorder %s60_s25, %s3090_s11  ;;  %p3095_p12 = scmp.lt.s32.totalorder %s60_s25, %s60_s25 }
  0x40   :  { %p3096_p13 = scmp.lt.s32.totalorder %s3090_s11, %s3090_s11 }
  0x42   :  { %p3097_p0 = por %p3096_p13, %p3095_p12 }
  0x44   :  { %41 = dma.hbm_to_vmem [thread:$0]  %s3504_s27, 512, %s36_s23, [#allocation4], %s3196_s16, %s3196_s16, %s3197_s30  }
  0x45   :  { %p3098_p1 = pnand %p3097_p0, %p3091_p11 }
  0x47   :  { %3101 = shalt.err (!%p3098_p1)
}
  0x48   :  { %65 = dma.hbm_to_vmem [thread:$0]  %s3485_s2, 256, %s60_s25, [#allocation7], %s3196_s16, %s3196_s16, %s3197_s30  }
  0x49   :  { %s3206_s3 = smov [#allocation11]   ;;  %s3207_s20 = smov [#allocation14]  }
  0x4a   :  { %s85_s29 = sshll.u32 %s3206_s3, 4  ;;  %s113_s21 = sshll.u32 %s3207_s20, 4  ;;  %s86_s29 = int_to_ptr.vmem [resolvable:$true] %s85_s29  ;;  %s114_s21 = int_to_ptr.vmem [resolvable:$true] %s113_s21 }
  0x4b   :  { %s3110_s22 = scalar_lea.vmem %s86_s29, 2048  ;;  %p3115_p3 = scmp.lt.s32.totalorder %s86_s29, %s86_s29 }
  0x4c   :  { %p3111_p2 = scmp.ne.s32.totalorder %s86_s29, %s3110_s22  ;;  %p3116_p4 = scmp.lt.s32.totalorder %s3110_s22, %s3110_s22 }
  0x4e   :  { %p3117_p5 = por %p3116_p4, %p3115_p3 }
  0x50   :  { %p3118_p6 = pnand %p3117_p5, %p3111_p2 }
  0x52   :  { %3121 = shalt.err (!%p3118_p6)
}
  0x53   :  { %91 = dma.hbm_to_vmem [thread:$0]  %s3488_s5, 2048, %s86_s29, [#allocation10], %s3202_s18, %s3202_s18, %s3203_s19  }
  0x54   :  { %s3130_s2 = scalar_lea.vmem %s114_s21, 4096  ;;  %p3135_p8 = scmp.lt.s32.totalorder %s114_s21, %s114_s21 }
  0x55   :  { %p3131_p7 = scmp.ne.s32.totalorder %s114_s21, %s3130_s2  ;;  %p3136_p9 = scmp.lt.s32.totalorder %s3130_s2, %s3130_s2 }
  0x57   :  { %p3137_p10 = por %p3136_p9, %p3135_p8 }
  0x59   :  { %p3138_p11 = pnand %p3137_p10, %p3131_p7 }
  0x5b   :  { %3141 = shalt.err (!%p3138_p11)
}
  0x5c   :  { %119 = dma.hbm_to_vmem [thread:$0]  %s3492_s9, 4096, %s114_s21, [#allocation13], %s3202_s18, %s3202_s18, %s3203_s19  }
  0x5d   :  { %s3208_s25 = smov [#allocation17]  }
  0x5e   :  { %s141_s7 = sshll.u32 %s3208_s25, 4  ;;  %s142_s7 = int_to_ptr.vmem [resolvable:$true] %s141_s7 }
  0x5f   :  { %s3150_s26 = scalar_lea.vmem %s142_s7, 4096  ;;  %p3155_p13 = scmp.lt.s32.totalorder %s142_s7, %s142_s7 }
  0x60   :  { %p3151_p12 = scmp.ne.s32.totalorder %s142_s7, %s3150_s26  ;;  %p3156_p0 = scmp.lt.s32.totalorder %s3150_s26, %s3150_s26 }
  0x62   :  { %p3157_p1 = por %p3156_p0, %p3155_p13 }
  0x64   :  { %p3158_p2 = pnand %p3157_p1, %p3151_p12 }
  0x66   :  { %3161 = shalt.err (!%p3158_p2)
}
  0x67   :  { %147 = dma.hbm_to_vmem [thread:$0]  %s3496_s13, 4096, %s142_s7, [#allocation16], %s3202_s18, %s3202_s18, %s3203_s19  }
  0x68   :  { %3182 = dma.done.wait [#allocation4], 512  }
  0x69   :  { %3183 = vsyncadd [#allocation4], 4294966784 }
  0x6a   :  { %3184 = dma.done.wait [#allocation7], 512  }
  0x6b   :  { %3185 = vsyncadd [#allocation7], 4294966784 }
  0x6c   :  { %3186 = dma.done.wait [#allocation10], 6144  }
  0x6d   :  { %3187 = vsyncadd [#allocation10], 4294961152 }
  0x6e   :  { %3188 = dma.done.wait [#allocation13], 6144  }
  0x6f   :  { %3189 = vsyncadd [#allocation13], 4294961152 }
  0x70   :  { %3190 = dma.done.wait [#allocation16], 8192  }
  0x71   :  { %3191 = vsyncadd [#allocation16], 4294959104  ;;  %v3209_v1 = vmov 0   ;;  %v2718_v2 = vld [vmem:[#allocation9 + $0xe4] ss:$16 sps:$4 sm:$0xff]   ;;  %v2749_v31 = vld [vmem:[#allocation3 + $0x8] sm:$0xff]   ;;  %v232_v56 = vlaneseq }
  0x72   :  { %468 = vmatprep.mubr.bf16.mxu0 %v3209_v1  ;;  %541 = vmatprep.mubr.bf16.mxu1 %v3209_v1  ;;  %v2720_v3 = vld [vmem:[#allocation9 + $0xe0] ss:$16 sps:$4 sm:$0xff]   ;;  %v2721_v4 = vld [vmem:[#allocation9 + $0xc4] ss:$16 sps:$4 sm:$0xff]   ;;  %v2772_v19 = vld [vmem:[#allocation9 + $0xec] ss:$16 sps:$4 sm:$0xff]  }
  0x73   :  { %2717 = vset.pattern.permute.xlu0 %v3209_v1  ;;  %436 = vmatprep.subr.bf16.mxu0 %v2718_v2  ;;  %v2723_v5 = vld [vmem:[#allocation9 + $0xc0] ss:$16 sps:$4 sm:$0xff]   ;;  %v2724_v6 = vld [vmem:[#allocation9 + $0xa4] ss:$16 sps:$4 sm:$0xff]   ;;  %v2774_v20 = vld [vmem:[#allocation9 + $0xe8] ss:$16 sps:$4 sm:$0xff]  }
  0x74   :  { %437 = vmatpush1.bf16.msra.mxu0 %v2720_v3  ;;  %v2726_v7 = vld [vmem:[#allocation9 + $0xa0] ss:$16 sps:$4 sm:$0xff]   ;;  %v2727_v8 = vld [vmem:[#allocation9 + $0x84] ss:$16 sps:$4 sm:$0xff]   ;;  %v2775_v21 = vld [vmem:[#allocation9 + $0xcc] ss:$16 sps:$4 sm:$0xff]   ;;  %509 = vmatprep.subr.bf16.mxu1 %v2772_v19 }
  0x75   :  { %438 = vmatprep.subr.bf16.mxu0 %v2721_v4  ;;  %v2729_v9 = vld [vmem:[#allocation9 + $0x80] ss:$16 sps:$4 sm:$0xff]   ;;  %v2730_v10 = vld [vmem:[#allocation9 + $0x64] ss:$16 sps:$4 sm:$0xff]   ;;  %510 = vmatpush1.bf16.msra.mxu1 %v2774_v20  ;;  %v2777_v25 = vld [vmem:[#allocation9 + $0xc8] ss:$16 sps:$4 sm:$0xff]  }
  0x76   :  { %v2732_v11 = vld [vmem:[#allocation9 + $0x60] ss:$16 sps:$4 sm:$0xff]   ;;  %v2733_v12 = vld [vmem:[#allocation9 + $0x44] ss:$16 sps:$4 sm:$0xff]   ;;  %511 = vmatprep.subr.bf16.mxu1 %v2775_v21  ;;  %v2778_v27 = vld [vmem:[#allocation9 + $0xac] ss:$16 sps:$4 sm:$0xff]  }
  0x77   :  { %v2735_v13 = vld [vmem:[#allocation9 + $0x40] ss:$16 sps:$4 sm:$0xff]   ;;  %v2736_v14 = vld [vmem:[#allocation9 + $0x24] ss:$16 sps:$4 sm:$0xff]   ;;  %v2780_v29 = vld [vmem:[#allocation9 + $0xa8] ss:$16 sps:$4 sm:$0xff]  }
  0x78   :  { %439 = vmatpush1.bf16.msra.mxu0 %v2723_v5  ;;  %v2738_v15 = vld [vmem:[#allocation9 + $0x20] ss:$16 sps:$4 sm:$0xff]   ;;  %v2739_v16 = vld [vmem:[#allocation9 + $0x4] ss:$16 sps:$4 sm:$0xff]   ;;  %v2781_v30 = vld [vmem:[#allocation9 + $0x8c] ss:$16 sps:$4 sm:$0xff]  }
  0x79   :  { %440 = vmatprep.subr.bf16.mxu0 %v2724_v6  ;;  %v2741_v17 = vld [vmem:[#allocation9] ss:$16 sps:$4 sm:$0xff]   ;;  %v2745_v18 = vld [vmem:[#allocation11 + $0x74] ss:$8 sps:$4 sm:$0xff]   ;;  %v2748_v24 = vld [vmem:[#allocation11 + $0x64] ss:$8 sps:$4 sm:$0xff]   ;;  %512 = vmatpush1.bf16.msra.mxu1 %v2777_v25 }
  0x7a   :  { %v3360_v22 = vld [vmem:[#allocation3] sm:$0xff]   ;;  %v2743_v23 = vld [vmem:[#allocation11 + $0x70] ss:$8 sps:$4 sm:$0xff]   ;;  %v2752_v28 = vld [vmem:[#allocation11 + $0x54] ss:$8 sps:$4 sm:$0xff]   ;;  %513 = vmatprep.subr.bf16.mxu1 %v2778_v27  ;;  %v3372_v57 = vshrl.u32 %v232_v56, 7 }
  0x7b   :  { %v2746_v26 = vld [vmem:[#allocation11 + $0x60] ss:$8 sps:$4 sm:$0xff]   ;;  %v2750_v32 = vld [vmem:[#allocation11 + $0x50] ss:$8 sps:$4 sm:$0xff]   ;;  %v2755_v33 = vld [vmem:[#allocation11 + $0x44] ss:$8 sps:$4 sm:$0xff]  }
  0x7c   :  { %441 = vmatpush1.bf16.msra.mxu0 %v2726_v7  ;;  %v2783_v34 = vld [vmem:[#allocation9 + $0x88] ss:$16 sps:$4 sm:$0xff]   ;;  %v2784_v35 = vld [vmem:[#allocation9 + $0x6c] ss:$16 sps:$4 sm:$0xff]   ;;  %v2756_v40 = vld [vmem:[#allocation3 + $0x10] sm:$0xff]   ;;  %v3375_v59 = vsub.s32 1, %v3372_v57 }
  0x7d   :  { %442 = vmatprep.subr.bf16.mxu0 %v2727_v8  ;;  %514 = vmatpush1.bf16.msra.mxu1 %v2780_v29  ;;  %v2753_v36 = vld [vmem:[#allocation11 + $0x40] ss:$8 sps:$4 sm:$0xff]   ;;  %v2759_v37 = vld [vmem:[#allocation11 + $0x34] ss:$8 sps:$4 sm:$0xff]   ;;  %v2757_v41 = vld [vmem:[#allocation11 + $0x30] ss:$8 sps:$4 sm:$0xff]  }
  0x7e   :  { %515 = vmatprep.subr.bf16.mxu1 %v2781_v30  ;;  %v2786_v38 = vld [vmem:[#allocation9 + $0x68] ss:$16 sps:$4 sm:$0xff]   ;;  %v2787_v39 = vld [vmem:[#allocation9 + $0x4c] ss:$16 sps:$4 sm:$0xff]   ;;  %v2770_v50 = vld [vmem:[#allocation6] sm:$0xff]   ;;  %v3378_v60 = vsub.s32 0, %v3372_v57 }
  0x7f   :  { %v2762_v42 = vld [vmem:[#allocation11 + $0x24] ss:$8 sps:$4 sm:$0xff]   ;;  %v2789_v43 = vld [vmem:[#allocation9 + $0x48] ss:$16 sps:$4 sm:$0xff]   ;;  %v2766_v45 = vld [vmem:[#allocation11 + $0x14] ss:$8 sps:$4 sm:$0xff]  }
  0x80   :  { %443 = vmatpush1.bf16.msra.mxu0 %v2729_v9  ;;  %v2760_v44 = vld [vmem:[#allocation11 + $0x20] ss:$8 sps:$4 sm:$0xff]   ;;  %v2763_v46 = vld [vmem:[#allocation3 + $0x18] sm:$0xff]   ;;  %v2769_v48 = vld [vmem:[#allocation11 + $0x4] ss:$8 sps:$4 sm:$0xff]   ;;  %vm1035_vm0 = vcmask 130048  }
  0x81   :  { %444 = vmatprep.subr.bf16.mxu0 %v2730_v10  ;;  %516 = vmatpush1.bf16.msra.mxu1 %v2783_v34  ;;  %v2764_v47 = vld [vmem:[#allocation11 + $0x10] ss:$8 sps:$4 sm:$0xff]   ;;  %v2767_v49 = vld [vmem:[#allocation11] ss:$8 sps:$4 sm:$0xff]   ;;  %v2790_v52 = vld [vmem:[#allocation9 + $0x2c] ss:$16 sps:$4 sm:$0xff]  }
  0x82   :  { %517 = vmatprep.subr.bf16.mxu1 %v2784_v35  ;;  %v2771_v51 = vld [vmem:[#allocation6 + $0x8] sm:$0xff]   ;;  %v3383_v62 = vld [vmem:[%s3487_s4] sm:$0xf]  ;;  %vm2504_vm1 = vcmask 253952  }
  0x83   :  { %v2792_v53 = vld [vmem:[#allocation9 + $0x28] ss:$16 sps:$4 sm:$0xff]   ;;  %v2793_v54 = vld [vmem:[#allocation9 + $0xc] ss:$16 sps:$4 sm:$0xff]   ;;  %v239_v0 = vrot.slane %v3383_v62, %v3375_v59  ;;  %v3389_v2 = vrot.slane %v3383_v62, %v3378_v60 }
  0x84   :  { %445 = vmatpush1.bf16.msra.mxu0 %v2732_v11  ;;  %v2795_v55 = vld [vmem:[#allocation9 + $0x8] ss:$16 sps:$4 sm:$0xff]  }
  0x85   :  { %446 = vmatprep.subr.bf16.mxu0 %v2733_v12  ;;  %518 = vmatpush1.bf16.msra.mxu1 %v2786_v38 }
  0x86   :  { %519 = vmatprep.subr.bf16.mxu1 %v2787_v39 }
  0x88   :  { %447 = vmatpush1.bf16.msra.mxu0 %v2735_v13 }
  0x89   :  { %448 = vmatprep.subr.bf16.mxu0 %v2736_v14  ;;  %520 = vmatpush1.bf16.msra.mxu1 %v2789_v43 }
  0x8a   :  { %521 = vmatprep.subr.bf16.mxu1 %v2790_v52  ;;  %v246_v52 = vsub.s32 3, %v3372_v57 }
  0x8c   :  { %449 = vmatpush1.bf16.msra.mxu0 %v2738_v15  ;;  %v247_v56 = vrot.slane %v3383_v62, %v246_v52 }
  0x8d   :  { %450 = vmatprep.subr.bf16.mxu0 %v2739_v16  ;;  %522 = vmatpush1.bf16.msra.mxu1 %v2792_v53 }
  0x8e   :  { %523 = vmatprep.subr.bf16.mxu1 %v2793_v54 }
  0x90   :  { %451 = vmatpush1.bf16.msra.mxu0 %v2741_v17 }
  0x91   :  { %702 = vmatprep.subr.bf16.mxu0 %v2745_v18  ;;  %524 = vmatpush1.bf16.msra.mxu1 %v2795_v55 }
  0x93   :  { %469 = vmatmul.mubr.bf16.vlgmr.msra.gmra.mxu0 %v3360_v22 }
  0x94   :  { %703 = vmatpush1.bf16.msra.mxu0 %v2743_v23  ;;  %478 = vmatprep.mubr.bf16.mxu0 %v3209_v1 }
  0x95   :  { %704 = vmatprep.subr.bf16.mxu0 %v2748_v24  ;;  %542 = vmatmul.mubr.bf16.vlgmr.msra.gmra.mxu1 %v3360_v22  ;;  %v598_v24 = vld [vmem:[%s3489_s6] sm:$0x3] }
  0x96   :  { %551 = vmatprep.mubr.bf16.mxu1 %v3209_v1  ;;  %v607_v27 = vrot.slane %v598_v24, %v3375_v59 }
  0x98   :  { %705 = vmatpush1.bf16.msra.mxu0 %v2746_v26 }
  0x99   :  { %706 = vmatprep.subr.bf16.mxu0 %v2752_v28  ;;  %v603_v28 = vrot.slane %v598_v24, %v3378_v60 }
  0x9b   :  { %479 = vmatmul.mubr.bf16.gmra.mxu0 %v2749_v31 }
  0x9c   :  { %707 = vmatpush1.bf16.msra.mxu0 %v2750_v32  ;;  %488 = vmatprep.mubr.bf16.mxu0 %v3209_v1 }
  0x9d   :  { %708 = vmatprep.subr.bf16.mxu0 %v2755_v33  ;;  %552 = vmatmul.mubr.bf16.gmra.mxu1 %v2749_v31 }
  0x9e   :  { %561 = vmatprep.mubr.bf16.mxu1 %v3209_v1 }
  0xa0   :  { %709 = vmatpush1.bf16.msra.mxu0 %v2753_v36 }
  0xa1   :  { %710 = vmatprep.subr.bf16.mxu0 %v2759_v37 }
  0xa3   :  { %489 = vmatmul.mubr.bf16.gmra.mxu0 %v2756_v40 }
  0xa4   :  { %711 = vmatpush1.bf16.msra.mxu0 %v2757_v41  ;;  %498 = vmatprep.mubr.bf16.mxu0 %v3209_v1 }
  0xa5   :  { %712 = vmatprep.subr.bf16.mxu0 %v2762_v42  ;;  %562 = vmatmul.mubr.bf16.gmra.mxu1 %v2756_v40 }
  0xa6   :  { %571 = vmatprep.mubr.bf16.mxu1 %v3209_v1 }
  0xa8   :  { %713 = vmatpush1.bf16.msra.mxu0 %v2760_v44 }
  0xa9   :  { %714 = vmatprep.subr.bf16.mxu0 %v2766_v45 }
  0xab   :  { %499 = vmatmul.mubr.bf16.gmra.mxu0 %v2763_v46 }
  0xac   :  { %715 = vmatpush1.bf16.msra.mxu0 %v2764_v47  ;;  %734 = vmatprep.mubr.bf16.mxu0 %v3209_v1 }
  0xad   :  { %716 = vmatprep.subr.bf16.mxu0 %v2769_v48  ;;  %572 = vmatmul.mubr.bf16.gmra.mxu1 %v2763_v46 }
  0xb0   :  { %717 = vmatpush1.bf16.msra.mxu0 %v2767_v49 }
  0xb3   :  { %735 = vmatmul.mubr.bf16.vlgmr.msra.gmra.mxu0 %v2770_v50 }
  0xb4   :  { %744 = vmatprep.mubr.bf16.mxu0 %v3209_v1 }
  0xbb   :  { %745 = vmatmul.mubr.bf16.gmra.mxu0 %v2771_v51  ;;  %v242_v51 = vsub.s32 2, %v3372_v57 }
  0xbd   :  { %v243_v54 = vrot.slane %v3383_v62, %v242_v51 }
 0x153   :  { %v470_v58 = vpop.f32.mrf.mxu0 }
 0x154   :  { %v471_v9 = vadd.f32 %v470_v58, %v3389_v2 }
 0x155   :  { %v472_v61 = vpop.f32.mrf.mxu0  ;;  %v543_v53 = vpop.f32.mrf.mxu1 }
 0x156   :  { %v473_v7 = vadd.f32 %v472_v61, %v239_v0 }
 0x157   :  { %v474_v63 = vpop.f32.mrf.mxu0  ;;  %v545_v55 = vpop.f32.mrf.mxu1 }
 0x158   :  { %v475_v5 = vadd.f32 %v474_v63, %v3389_v2 }
 0x159   :  { %v476_v3 = vpop.f32.mrf.mxu0  ;;  %v547_v58 = vpop.f32.mrf.mxu1 }
 0x15a   :  { %v477_v4 = vadd.f32 %v476_v3, %v239_v0  ;;  %v548_v61 = vadd.f32 %v547_v58, %v243_v54  ;;  %v544_v3 = vadd.f32 %v543_v53, %v243_v54 }
 0x15b   :  { %v480_v6 = vpop.f32.mrf.mxu0  ;;  %v549_v63 = vpop.f32.mrf.mxu1 }
 0x15c   :  { %783 = vmatprep.subr.mxu0 %v477_v4  ;;  %v481_v17 = vadd.f32 %v480_v6, %v3389_v2 }
 0x15d   :  { %v482_v8 = vpop.f32.mrf.mxu0  ;;  %784 = vmatpush1.xpose.msra.mxu0 %v475_v5  ;;  %v553_v4 = vpop.f32.mrf.mxu1 }
 0x15e   :  { %785 = vmatprep.subr.mxu0 %v473_v7  ;;  %v483_v15 = vadd.f32 %v482_v8, %v239_v0  ;;  %v3408_v5 = vadd.f32 %v553_v4, %v243_v54 }
 0x15f   :  { %v484_v10 = vpop.f32.mrf.mxu0  ;;  %v555_v6 = vpop.f32.mrf.mxu1 }
 0x160   :  { %v485_v13 = vadd.f32 %v484_v10, %v3389_v2  ;;  %v3410_v7 = vadd.f32 %v555_v6, %v247_v56 }
 0x161   :  { %v486_v11 = vpop.f32.mrf.mxu0  ;;  %786 = vmatpush1.xpose.msra.mxu0 %v471_v9  ;;  %v557_v8 = vpop.f32.mrf.mxu1 }
 0x162   :  { %v487_v12 = vadd.f32 %v486_v11, %v239_v0  ;;  %v3412_v9 = vadd.f32 %v557_v8, %v243_v54 }
 0x163   :  { %v490_v14 = vpop.f32.mrf.mxu0  ;;  %v559_v62 = vpop.f32.mrf.mxu1 }
 0x164   :  { %853 = vmatprep.subr.mxu1 %v487_v12  ;;  %v491_v40 = vadd.f32 %v490_v14, %v3389_v2  ;;  %v560_v10 = vadd.f32 %v559_v62, %v247_v56 }
 0x165   :  { %v492_v16 = vpop.f32.mrf.mxu0  ;;  %854 = vmatpush1.xpose.msra.mxu1 %v485_v13  ;;  %v563_v11 = vpop.f32.mrf.mxu1 }
 0x166   :  { %855 = vmatprep.subr.mxu1 %v483_v15  ;;  %v493_v35 = vadd.f32 %v492_v16, %v239_v0  ;;  %v3414_v12 = vadd.f32 %v563_v11, %v243_v54 }
 0x167   :  { %v494_v18 = vpop.f32.mrf.mxu0  ;;  %v565_v13 = vpop.f32.mrf.mxu1 }
 0x168   :  { %v495_v34 = vadd.f32 %v494_v18, %v3389_v2  ;;  %v3416_v14 = vadd.f32 %v565_v13, %v247_v56 }
 0x169   :  { %v496_v19 = vpop.f32.mrf.mxu0  ;;  %856 = vmatpush1.xpose.msra.mxu1 %v481_v17  ;;  %v567_v15 = vpop.f32.mrf.mxu1 }
 0x16a   :  { %v497_v20 = vadd.f32 %v496_v19, %v239_v0  ;;  %v3418_v16 = vadd.f32 %v567_v15, %v243_v54 }
 0x16b   :  { %v500_v21 = vpop.f32.mrf.mxu0  ;;  %v569_v17 = vpop.f32.mrf.mxu1 }
 0x16c   :  { %923 = vmatprep.subr.mxu0 %v497_v20  ;;  %v501_v47 = vadd.f32 %v500_v21, %v3389_v2  ;;  %v3420_v18 = vadd.f32 %v569_v17, %v247_v56 }
 0x16d   :  { %v502_v22 = vpop.f32.mrf.mxu0  ;;  %v573_v19 = vpop.f32.mrf.mxu1 }
 0x16e   :  { %v503_v42 = vadd.f32 %v502_v22, %v239_v0 }
 0x16f   :  { %v504_v23 = vpop.f32.mrf.mxu0  ;;  %v575_v20 = vpop.f32.mrf.mxu1 }
 0x170   :  { %v505_v41 = vadd.f32 %v504_v23, %v3389_v2  ;;  %v550_v2 = vadd.f32 %v549_v63, %v247_v56  ;;  %v576_v24 = vadd.f32 %v575_v20, %v247_v56  ;;  %v3210_v63 = vmov 0.0  }
 0x171   :  { %v506_v25 = vpop.f32.mrf.mxu0  ;;  %v577_v21 = vpop.f32.mrf.mxu1 }
 0x172   :  { %v507_v26 = vadd.f32 %v506_v25, %v239_v0  ;;  %v546_v0 = vadd.f32 %v545_v55, %v247_v56  ;;  %v578_v22 = vadd.f32 %v577_v21, %v243_v54 }
 0x173   :  { %v736_v29 = vpop.f32.mrf.mxu0  ;;  %v579_v23 = vpop.f32.mrf.mxu1 }
 0x174   :  { %993 = vmatprep.subr.mxu1 %v507_v26  ;;  %v737_v32 = vadd.f32 %v736_v29, %v603_v28  ;;  %v580_v25 = vadd.f32 %v579_v23, %v247_v56  ;;  %v574_v26 = vadd.f32 %v573_v19, %v243_v54 }
 0x175   :  { %v738_v30 = vpop.f32.mrf.mxu0 }
 0x176   :  { %v739_v31 = vadd.f32 %v738_v30, %v607_v27 }
 0x177   :  { %v740_v33 = vpop.f32.mrf.mxu0 }
 0x178   :  { %819 = vmatprep.mubr.f32.mxu0 %v739_v31  ;;  %v741_v38 = vadd.f32 %v740_v33, %v603_v28 }
 0x179   :  { %v742_v36 = vpop.f32.mrf.mxu0  ;;  %820 = vmatmul.mubr.f32.vlgmr.msra.gmra.mxu0 %v737_v32 }
 0x17a   :  { %v743_v37 = vadd.f32 %v742_v36, %v607_v27  ;;  %924 = vmatpush1.xpose.msra.mxu0 %v495_v34 }
 0x17b   :  { %925 = vmatprep.subr.mxu0 %v493_v35  ;;  %v746_v39 = vpop.f32.mrf.mxu0 }
 0x17c   :  { %889 = vmatprep.mubr.f32.mxu1 %v743_v37  ;;  %v747_v45 = vadd.f32 %v746_v39, %v603_v28 }
 0x17d   :  { %v748_v43 = vpop.f32.mrf.mxu0  ;;  %890 = vmatmul.mubr.f32.vlgmr.msra.gmra.mxu1 %v741_v38 }
 0x17e   :  { %v749_v44 = vadd.f32 %v748_v43, %v607_v27  ;;  %926 = vmatpush1.xpose.msra.mxu0 %v491_v40  ;;  %994 = vmatpush1.xpose.msra.mxu1 %v505_v41 }
 0x17f   :  { %995 = vmatprep.subr.mxu1 %v503_v42  ;;  %v750_v46 = vpop.f32.mrf.mxu0  ;;  %1139 = vmatprep.subr.mxu0 %v550_v2 }
 0x180   :  { %959 = vmatprep.mubr.f32.mxu0 %v749_v44  ;;  %v751_v50 = vadd.f32 %v750_v46, %v603_v28 }
 0x181   :  { %v752_v48 = vpop.f32.mrf.mxu0  ;;  %960 = vmatmul.mubr.f32.vlgmr.msra.gmra.mxu0 %v747_v45 }
 0x182   :  { %v753_v49 = vadd.f32 %v752_v48, %v607_v27  ;;  %996 = vmatpush1.xpose.msra.mxu1 %v501_v47  ;;  %1140 = vmatpush1.msra.mxu0 %v548_v61 }
 0x183   :  { %1141 = vmatprep.subr.mxu0 %v546_v0  ;;  %1361 = vmatprep.subr.mxu1 %v580_v25  ;;  %v2824_v0 = vld [vmem:[#allocation14 + $0x74] ss:$8 sps:$4 sm:$0xff]  }
 0x184   :  { %1029 = vmatprep.mubr.f32.mxu1 %v753_v49  ;;  %1142 = vmatpush1.msra.mxu0 %v544_v3 }
 0x185   :  { %1030 = vmatmul.mubr.f32.vlgmr.msra.gmra.mxu1 %v751_v50  ;;  %1213 = vmatprep.subr.mxu0 %v560_v10 }
 0x186   :  { %1362 = vmatpush1.msra.mxu1 %v578_v22  ;;  %1175 = vmatprep.mubr.f32.mxu0 %v3210_v63 }
 0x187   :  { %1363 = vmatprep.subr.mxu1 %v576_v24  ;;  %1397 = vmatprep.mubr.f32.mxu1 %v3210_v63 }
 0x188   :  { %1364 = vmatpush1.msra.mxu1 %v574_v26 }
 0x189   :  { %1825 = vmatprep.subr.bf16.mxu1 %v2824_v0  ;;  %v2819_v0 = vld [vmem:[#allocation12 + $0x4] ss:$8 sps:$4 sm:$0xff]  }
 0x239   :  { %v821_v27 = vpop.f32.mrf.mxu0 }
 0x23a   :  { %v1036_v28 = vsel %vm1035_vm0, %v821_v27, -inf }
 0x23b   :  { %1037 = vmax.xlane.f32.xlu0 %v1036_v28  ;;  %v823_v29 = vpop.f32.mrf.mxu0 }
 0x23d   :  { %v891_v30 = vpop.f32.mrf.mxu1 }
 0x23e   :  { %v1039_v31 = vsel %vm1035_vm0, %v891_v30, -inf }
 0x23f   :  { %v893_v32 = vpop.f32.mrf.mxu1  ;;  %1040 = vmax.xlane.f32.xlu0 %v1039_v31 }
 0x241   :  { %v961_v33 = vpop.f32.mrf.mxu0 }
 0x242   :  { %v1042_v34 = vsel %vm1035_vm0, %v961_v33, -inf }
 0x243   :  { %1043 = vmax.xlane.f32.xlu1 %v1042_v34  ;;  %v963_v35 = vpop.f32.mrf.mxu0 }
 0x245   :  { %v1031_v36 = vpop.f32.mrf.mxu1 }
 0x246   :  { %v1045_v37 = vsel %vm1035_vm0, %v1031_v36, -inf }
 0x247   :  { %v1033_v38 = vpop.f32.mrf.mxu1  ;;  %1046 = vmax.xlane.f32.xlu1 %v1045_v37 }
 0x2c4   :  { %v1038_v39 = vpop.xlane.xlu0 %1037 }
 0x2c5   :  { %v1048_v40 = vsub.f32 %v821_v27, %v1038_v39 }
 0x2c7   :  { %v1052_v41 = vmul.f32 1.442695, %v1048_v40 }
 0x2c8   :  { %v1041_v42 = vpop.xlane.xlu0 %1040 }
 0x2c9   :  { %2966 = vpow2.f32 %v1052_v41  ;;  %v1049_v43 = vsub.f32 %v891_v30, %v1041_v42  ;;  %v2798_v42 = vld [vmem:[#allocation12 + $0x74] ss:$8 sps:$4 sm:$0xff]  }
 0x2cb   :  { %v1054_v44 = vmul.f32 1.442695, %v1049_v43 }
 0x2cc   :  { %v1044_v45 = vpop.xlane.xlu1 %1043 }
 0x2cd   :  { %2968 = vpow2.f32 %v1054_v44  ;;  %v1050_v46 = vsub.f32 %v961_v33, %v1044_v45  ;;  %v2796_v45 = vld [vmem:[#allocation12 + $0x70] ss:$8 sps:$4 sm:$0xff]  }
 0x2cf   :  { %v1056_v47 = vmul.f32 1.442695, %v1050_v46 }
 0x2d0   :  { %v1047_v48 = vpop.xlane.xlu1 %1046 }
 0x2d1   :  { %2970 = vpow2.f32 %v1056_v47  ;;  %v1051_v49 = vsub.f32 %v1031_v36, %v1047_v48  ;;  %v2822_v47 = vld [vmem:[#allocation14 + $0x70] ss:$8 sps:$4 sm:$0xff]   ;;  %v2804_v48 = vld [vmem:[#allocation12 + $0x54] ss:$8 sps:$4 sm:$0xff]  }
 0x2d3   :  { %v1058_v50 = vmul.f32 1.442695, %v1051_v49  ;;  %v2827_v49 = vld [vmem:[#allocation14 + $0x64] ss:$8 sps:$4 sm:$0xff]  }
 0x2d5   :  { %2972 = vpow2.f32 %v1058_v50  ;;  %v2825_v50 = vld [vmem:[#allocation14 + $0x60] ss:$8 sps:$4 sm:$0xff]  }
 0x2d6   :  { %v2967_v51 = vpop.eup %2966 }
 0x2d7   :  { %v1060_v52 = vsel %vm1035_vm0, %v2967_v51, 0.0 }
 0x2d8   :  { %1061 = vadd.xlane.f32.xlu0 %v1060_v52  ;;  %v2805_v52 = vld [vmem:[#allocation12 + $0x40] ss:$8 sps:$4 sm:$0xff]  }
 0x2da   :  { %v2969_v53 = vpop.eup %2968 }
 0x2db   :  { %v1063_v54 = vsel %vm1035_vm0, %v2969_v53, 0.0 }
 0x2dc   :  { %1064 = vadd.xlane.f32.xlu1 %v1063_v54  ;;  %v2810_v54 = vld [vmem:[#allocation12 + $0x34] ss:$8 sps:$4 sm:$0xff]  }
 0x2de   :  { %v2971_v55 = vpop.eup %2970 }
 0x2df   :  { %v1066_v56 = vsel %vm1035_vm0, %v2971_v55, 0.0 }
 0x2e0   :  { %1067 = vadd.xlane.f32.xlu0 %v1066_v56  ;;  %v2813_v56 = vld [vmem:[#allocation12 + $0x24] ss:$8 sps:$4 sm:$0xff]  }
 0x2e2   :  { %v2973_v58 = vpop.eup %2972 }
 0x2e3   :  { %v1069_v61 = vsel %vm1035_vm0, %v2973_v58, 0.0 }
 0x2e4   :  { %1070 = vadd.xlane.f32.xlu1 %v1069_v61  ;;  %v2816_v61 = vld [vmem:[#allocation12 + $0x14] ss:$8 sps:$4 sm:$0xff]  }
 0x361   :  { %v1062_v2 = vpop.xlane.xlu0 %1061 }
 0x362   :  { %2974 = vrcp.f32 %v1062_v2  ;;  %v2817_v2 = vld [vmem:[#allocation12] ss:$8 sps:$4 sm:$0xff]  }
 0x365   :  { %v1065_v3 = vpop.xlane.xlu1 %1064 }
 0x366   :  { %2976 = vrcp.f32 %v1065_v3  ;;  %v2820_v3 = vld [vmem:[#allocation8] sm:$0xff]  }
 0x369   :  { %v1068_v4 = vpop.xlane.xlu0 %1067 }
 0x36a   :  { %2978 = vrcp.f32 %v1068_v4  ;;  %v2821_v4 = vld [vmem:[#allocation8 + $0x8] sm:$0xff]  }
 0x36d   :  { %v1071_v6 = vpop.xlane.xlu1 %1070 }
 0x36e   :  { %2980 = vrcp.f32 %v1071_v6  ;;  %v2833_v6 = vld [vmem:[#allocation14 + $0x44] ss:$8 sps:$4 sm:$0xff]  }
 0x36f   :  { %v2975_v8 = vpop.eup %2974 }
 0x370   :  { %v1073_v62 = vmul.f32 %v2975_v8, %v2967_v51  ;;  %v2830_v51 = vld [vmem:[#allocation14 + $0x54] ss:$8 sps:$4 sm:$0xff]   ;;  %v2831_v8 = vld [vmem:[#allocation14 + $0x40] ss:$8 sps:$4 sm:$0xff]  }
 0x372   :  { %v1080_v10 = vsel %vm1035_vm0, %v1073_v62, 0.0  ;;  %v2836_v62 = vld [vmem:[#allocation14 + $0x34] ss:$8 sps:$4 sm:$0xff]  }
 0x373   :  { %v2977_v11 = vpop.eup %2976  ;;  %v1081_v13 = vrot.slane %v1080_v10, 4 }
 0x374   :  { %v1075_v15 = vmul.f32 %v2977_v11, %v2969_v53  ;;  %v2828_v53 = vld [vmem:[#allocation14 + $0x50] ss:$8 sps:$4 sm:$0xff]   ;;  %v2839_v11 = vld [vmem:[#allocation14 + $0x24] ss:$8 sps:$4 sm:$0xff]  }
 0x375   :  { %v1082_v17 = vadd.f32 %v1081_v13, %v1080_v10  ;;  %v2834_v10 = vld [vmem:[#allocation14 + $0x30] ss:$8 sps:$4 sm:$0xff]   ;;  %v2837_v13 = vld [vmem:[#allocation14 + $0x20] ss:$8 sps:$4 sm:$0xff]  }
 0x376   :  { %v1087_v19 = vsel %vm1035_vm0, %v1075_v15, 0.0  ;;  %v2842_v15 = vld [vmem:[#allocation14 + $0x14] ss:$8 sps:$4 sm:$0xff]  }
 0x377   :  { %v2979_v20 = vpop.eup %2978  ;;  %v1088_v21 = vrot.slane %v1087_v19, 4  ;;  %v1083_v22 = vrot.slane %v1082_v17, 2 }
 0x378   :  { %v1077_v23 = vmul.f32 %v2979_v20, %v2971_v55  ;;  %v2808_v55 = vld [vmem:[#allocation12 + $0x30] ss:$8 sps:$4 sm:$0xff]   ;;  %v2848_v20 = vld [vmem:[#allocation14 + $0xf4] ss:$8 sps:$4 sm:$0xff]  }
 0x379   :  { %v1084_v24 = vadd.f32 %v1083_v22, %v1082_v17  ;;  %v1089_v25 = vadd.f32 %v1088_v21, %v1087_v19  ;;  %v2840_v17 = vld [vmem:[#allocation14 + $0x10] ss:$8 sps:$4 sm:$0xff]   ;;  %v2843_v19 = vld [vmem:[#allocation14] ss:$8 sps:$4 sm:$0xff]   ;;  %v2851_v22 = vld [vmem:[#allocation14 + $0xe4] ss:$8 sps:$4 sm:$0xff]  }
 0x37a   :  { %v1094_v26 = vsel %vm1035_vm0, %v1077_v23, 0.0  ;;  %v2846_v21 = vld [vmem:[#allocation14 + $0xf0] ss:$8 sps:$4 sm:$0xff]   ;;  %v2849_v23 = vld [vmem:[#allocation14 + $0xe0] ss:$8 sps:$4 sm:$0xff]  }
 0x37b   :  { %v2981_v27 = vpop.eup %2980  ;;  %v1095_v28 = vrot.slane %v1094_v26, 4  ;;  %v1085_v29 = vrot.slane %v1084_v24, 1  ;;  %v1090_v30 = vrot.slane %v1089_v25, 2 }
 0x37c   :  { %v1079_v31 = vmul.f32 %v2981_v27, %v2973_v58  ;;  %v2811_v58 = vld [vmem:[#allocation12 + $0x20] ss:$8 sps:$4 sm:$0xff]  }
 0x37d   :  { %v1086_v32 = vadd.f32 %v1085_v29, %v1084_v24  ;;  %v1091_v33 = vadd.f32 %v1090_v30, %v1089_v25  ;;  %v1096_v34 = vadd.f32 %v1095_v28, %v1094_v26  ;;  %v2854_v24 = vld [vmem:[#allocation14 + $0xd4] ss:$8 sps:$4 sm:$0xff]   ;;  %v2852_v25 = vld [vmem:[#allocation14 + $0xd0] ss:$8 sps:$4 sm:$0xff]   ;;  %v2857_v26 = vld [vmem:[#allocation14 + $0xc4] ss:$8 sps:$4 sm:$0xff]  }
 0x37e   :  { %v1101_v35 = vsel %vm1035_vm0, %v1079_v31, 0.0  ;;  %v2855_v27 = vld [vmem:[#allocation14 + $0xc0] ss:$8 sps:$4 sm:$0xff]   ;;  %v2860_v28 = vld [vmem:[#allocation14 + $0xb4] ss:$8 sps:$4 sm:$0xff]  }
 0x37f   :  { %v1102_v36 = vrot.slane %v1101_v35, 4  ;;  %2579 = vmatmul.mubr.msk.f32.vlgmr.msra.gmra.mxu0 %vm1035_vm0, %v1086_v32  ;;  %v1092_v37 = vrot.slane %v1091_v33, 1  ;;  %v1097_v38 = vrot.slane %v1096_v34, 2  ;;  %v2858_v29 = vld [vmem:[#allocation14 + $0xb0] ss:$8 sps:$4 sm:$0xff]  }
 0x380   :  { %1214 = vmatpush1.msra.mxu0 %v3412_v9  ;;  %1249 = vmatprep.mubr.f32.mxu0 %v3210_v63  ;;  %v2863_v30 = vld [vmem:[#allocation14 + $0xa4] ss:$8 sps:$4 sm:$0xff]   ;;  %v2861_v31 = vld [vmem:[#allocation14 + $0xa0] ss:$8 sps:$4 sm:$0xff]   ;;  %v2866_v32 = vld [vmem:[#allocation14 + $0x94] ss:$8 sps:$4 sm:$0xff]  }
 0x381   :  { %1215 = vmatprep.subr.mxu0 %v3410_v7  ;;  %v1093_v39 = vadd.f32 %v1092_v37, %v1091_v33  ;;  %v1098_v40 = vadd.f32 %v1097_v38, %v1096_v34  ;;  %v1103_v41 = vadd.f32 %v1102_v36, %v1101_v35  ;;  %v2801_v7 = vld [vmem:[#allocation12 + $0x64] ss:$8 sps:$4 sm:$0xff]   ;;  %v2864_v33 = vld [vmem:[#allocation14 + $0x90] ss:$8 sps:$4 sm:$0xff]   ;;  %v2867_v35 = vld [vmem:[#allocation14 + $0x80] ss:$8 sps:$4 sm:$0xff]  }
 0x382   :  { %1216 = vmatpush1.msra.mxu0 %v3408_v5  ;;  %v2869_v34 = vld [vmem:[#allocation14 + $0x84] ss:$8 sps:$4 sm:$0xff]   ;;  %v2870_v36 = vld [vmem:[#allocation15 + $0x70] ss:$8 sps:$4 sm:$0xff]   ;;  %v2872_v37 = vld [vmem:[#allocation15 + $0x74] ss:$8 sps:$4 sm:$0xff]  }
 0x383   :  { %1287 = vmatprep.subr.mxu0 %v3420_v18  ;;  %2580 = vmatmul.mubr.msk.f32.vlgmr.msra.gmra.mxu0 %vm1035_vm0, %v1093_v39  ;;  %v1099_v43 = vrot.slane %v1098_v40, 1  ;;  %v1104_v44 = vrot.slane %v1103_v41, 2  ;;  %v2799_v18 = vld [vmem:[#allocation12 + $0x60] ss:$8 sps:$4 sm:$0xff]   ;;  %v2875_v38 = vld [vmem:[#allocation15 + $0x64] ss:$8 sps:$4 sm:$0xff]  }
 0x384   :  { %1288 = vmatpush1.msra.mxu0 %v3418_v16  ;;  %1323 = vmatprep.mubr.f32.mxu0 %v3210_v63  ;;  %v2814_v63 = vld [vmem:[#allocation12 + $0x10] ss:$8 sps:$4 sm:$0xff]   ;;  %v2873_v39 = vld [vmem:[#allocation15 + $0x60] ss:$8 sps:$4 sm:$0xff]  }
 0x385   :  { %1289 = vmatprep.subr.mxu0 %v3416_v14  ;;  %v1100_v9 = vadd.f32 %v1099_v43, %v1098_v40  ;;  %v1105_v46 = vadd.f32 %v1104_v44, %v1103_v41  ;;  %v2802_v14 = vld [vmem:[#allocation12 + $0x50] ss:$8 sps:$4 sm:$0xff]   ;;  %v2878_v40 = vld [vmem:[#allocation15 + $0x54] ss:$8 sps:$4 sm:$0xff]   ;;  %v2879_v43 = vld [vmem:[#allocation15 + $0x40] ss:$8 sps:$4 sm:$0xff]  }
 0x386   :  { %1290 = vmatpush1.msra.mxu0 %v3414_v12  ;;  %v2807_v12 = vld [vmem:[#allocation12 + $0x44] ss:$8 sps:$4 sm:$0xff]   ;;  %v2876_v41 = vld [vmem:[#allocation15 + $0x50] ss:$8 sps:$4 sm:$0xff]   ;;  %v2884_v44 = vld [vmem:[#allocation15 + $0x34] ss:$8 sps:$4 sm:$0xff]  }
 0x387   :  { %1524 = vmatprep.subr.bf16.mxu0 %v2798_v42  ;;  %2581 = vmatmul.mubr.msk.f32.vlgmr.msra.gmra.mxu0 %vm1035_vm0, %v1100_v9  ;;  %v1106_v5 = vrot.slane %v1105_v46, 1  ;;  %v2881_v42 = vld [vmem:[#allocation15 + $0x44] ss:$8 sps:$4 sm:$0xff]  }
 0x388   :  { %1525 = vmatpush1.bf16.msra.mxu0 %v2796_v45  ;;  %1556 = vmatprep.mubr.bf16.mxu0 %v3209_v1  ;;  %v2882_v45 = vld [vmem:[#allocation15 + $0x30] ss:$8 sps:$4 sm:$0xff]   ;;  %v2887_v9 = vld [vmem:[#allocation15 + $0x24] ss:$8 sps:$4 sm:$0xff]  }
 0x389   :  { %1526 = vmatprep.subr.bf16.mxu0 %v2801_v7  ;;  %v1107_v16 = vadd.f32 %v1106_v5, %v1105_v46  ;;  %v2885_v7 = vld [vmem:[#allocation15 + $0x20] ss:$8 sps:$4 sm:$0xff]   ;;  %v2890_v46 = vld [vmem:[#allocation15 + $0x14] ss:$8 sps:$4 sm:$0xff]   ;;  %v2888_v5 = vld [vmem:[#allocation15 + $0x10] ss:$8 sps:$4 sm:$0xff]  }
 0x38b   :  { %2582 = vmatmul.mubr.msk.f32.vlgmr.msra.gmra.mxu1 %vm1035_vm0, %v1107_v16  ;;  %v2896_v16 = vld [vmem:[#allocation15 + $0xf4] ss:$8 sps:$4 sm:$0xff]  }
 0x38c   :  { %1527 = vmatpush1.bf16.msra.mxu0 %v2799_v18  ;;  %1826 = vmatpush1.bf16.msra.mxu1 %v2822_v47  ;;  %v2893_v18 = vld [vmem:[#allocation15 + $0x4] ss:$8 sps:$4 sm:$0xff]   ;;  %v2891_v47 = vld [vmem:[#allocation15] ss:$8 sps:$4 sm:$0xff]  }
 0x38d   :  { %1528 = vmatprep.subr.bf16.mxu0 %v2804_v48  ;;  %1827 = vmatprep.subr.bf16.mxu1 %v2827_v49  ;;  %v2894_v48 = vld [vmem:[#allocation15 + $0xf0] ss:$8 sps:$4 sm:$0xff]   ;;  %v2899_v49 = vld [vmem:[#allocation15 + $0xe4] ss:$8 sps:$4 sm:$0xff]  }
 0x390   :  { %1529 = vmatpush1.bf16.msra.mxu0 %v2802_v14  ;;  %1828 = vmatpush1.bf16.msra.mxu1 %v2825_v50  ;;  %v2897_v14 = vld [vmem:[#allocation15 + $0xe0] ss:$8 sps:$4 sm:$0xff]   ;;  %v2902_v50 = vld [vmem:[#allocation15 + $0xd4] ss:$8 sps:$4 sm:$0xff]  }
 0x391   :  { %1530 = vmatprep.subr.bf16.mxu0 %v2807_v12  ;;  %1829 = vmatprep.subr.bf16.mxu1 %v2830_v51  ;;  %v2900_v12 = vld [vmem:[#allocation15 + $0xd0] ss:$8 sps:$4 sm:$0xff]   ;;  %v2905_v51 = vld [vmem:[#allocation15 + $0xc4] ss:$8 sps:$4 sm:$0xff]  }
 0x394   :  { %1531 = vmatpush1.bf16.msra.mxu0 %v2805_v52  ;;  %1830 = vmatpush1.bf16.msra.mxu1 %v2828_v53  ;;  %v2903_v52 = vld [vmem:[#allocation15 + $0xc0] ss:$8 sps:$4 sm:$0xff]   ;;  %v2908_v53 = vld [vmem:[#allocation15 + $0xb4] ss:$8 sps:$4 sm:$0xff]  }
 0x395   :  { %1532 = vmatprep.subr.bf16.mxu0 %v2810_v54  ;;  %1831 = vmatprep.subr.bf16.mxu1 %v2833_v6  ;;  %v2906_v54 = vld [vmem:[#allocation15 + $0xb0] ss:$8 sps:$4 sm:$0xff]  }
 0x398   :  { %1533 = vmatpush1.bf16.msra.mxu0 %v2808_v55  ;;  %1832 = vmatpush1.bf16.msra.mxu1 %v2831_v8 }
 0x399   :  { %1534 = vmatprep.subr.bf16.mxu0 %v2813_v56  ;;  %1833 = vmatprep.subr.bf16.mxu1 %v2836_v62 }
 0x39c   :  { %1535 = vmatpush1.bf16.msra.mxu0 %v2811_v58  ;;  %1834 = vmatpush1.bf16.msra.mxu1 %v2834_v10 }
 0x39d   :  { %1536 = vmatprep.subr.bf16.mxu0 %v2816_v61  ;;  %1835 = vmatprep.subr.bf16.mxu1 %v2839_v11 }
 0x3a0   :  { %1537 = vmatpush1.bf16.msra.mxu0 %v2814_v63  ;;  %1836 = vmatpush1.bf16.msra.mxu1 %v2837_v13 }
 0x3a1   :  { %1538 = vmatprep.subr.bf16.mxu0 %v2819_v0  ;;  %1837 = vmatprep.subr.bf16.mxu1 %v2842_v15 }
 0x3a4   :  { %1539 = vmatpush1.bf16.msra.mxu0 %v2817_v2  ;;  %1838 = vmatpush1.bf16.msra.mxu1 %v2840_v17  ;;  %v1420_v2 = vld [vmem:[%s3491_s8] sm:$0x3] }
 0x3a5   :  { %2094 = vmatprep.subr.bf16.mxu0 %v2872_v37  ;;  %v1425_v6 = vrot.slane %v1420_v2, %v3378_v60 }
 0x3a7   :  { %1557 = vmatmul.mubr.bf16.vlgmr.msra.gmra.mxu0 %v2820_v3 }
 0x3a8   :  { %1566 = vmatprep.mubr.bf16.mxu0 %v3209_v1  ;;  %v2845_v1 = vld [vmem:[#allocation14 + $0x4] ss:$8 sps:$4 sm:$0xff]   ;;  %2095 = vmatpush1.bf16.msra.mxu0 %v2870_v36 }
 0x3a9   :  { %1839 = vmatprep.subr.bf16.mxu1 %v2845_v1  ;;  %2096 = vmatprep.subr.bf16.mxu0 %v2875_v38 }
 0x3aa   :  { %1840 = vmatpush1.bf16.msra.mxu1 %v2843_v19 }
 0x3ab   :  { %1841 = vmatprep.subr.bf16.mxu1 %v2848_v20 }
 0x3ac   :  { %2097 = vmatpush1.bf16.msra.mxu0 %v2873_v39 }
 0x3ad   :  { %2098 = vmatprep.subr.bf16.mxu0 %v2878_v40 }
 0x3ae   :  { %1842 = vmatpush2.bf16.msra.mxu1 %v2846_v21 }
 0x3af   :  { %1567 = vmatmul.mubr.bf16.gmra.mxu0 %v2821_v4  ;;  %1843 = vmatprep.subr.bf16.mxu1 %v2851_v22  ;;  %v1429_v4 = vrot.slane %v1420_v2, %v3375_v59  ;;  %v2941_v2 = vld [vmem:[#allocation17 + $0x4] ss:$8 sps:$4 sm:$0xff]  }
 0x3b0   :  { %2099 = vmatpush1.bf16.msra.mxu0 %v2876_v41 }
 0x3b1   :  { %2100 = vmatprep.subr.bf16.mxu0 %v2881_v42 }
 0x3b2   :  { %1844 = vmatpush2.bf16.msra.mxu1 %v2849_v23 }
 0x3b3   :  { %1845 = vmatprep.subr.bf16.mxu1 %v2854_v24 }
 0x3b4   :  { %2101 = vmatpush1.bf16.msra.mxu0 %v2879_v43 }
 0x3b5   :  { %2102 = vmatprep.subr.bf16.mxu0 %v2884_v44 }
 0x3b6   :  { %1846 = vmatpush2.bf16.msra.mxu1 %v2852_v25 }
 0x3b7   :  { %1847 = vmatprep.subr.bf16.mxu1 %v2857_v26 }
 0x3b8   :  { %2103 = vmatpush1.bf16.msra.mxu0 %v2882_v45 }
 0x3b9   :  { %2104 = vmatprep.subr.bf16.mxu0 %v2887_v9 }
 0x3ba   :  { %1848 = vmatpush2.bf16.msra.mxu1 %v2855_v27 }
 0x3bb   :  { %1849 = vmatprep.subr.bf16.mxu1 %v2860_v28 }
 0x3bc   :  { %2105 = vmatpush1.bf16.msra.mxu0 %v2885_v7 }
 0x3bd   :  { %2106 = vmatprep.subr.bf16.mxu0 %v2890_v46  ;;  %v2911_v46 = vld [vmem:[#allocation15 + $0xa4] ss:$8 sps:$4 sm:$0xff]  }
 0x3be   :  { %1850 = vmatpush2.bf16.msra.mxu1 %v2858_v29 }
 0x3bf   :  { %1851 = vmatprep.subr.bf16.mxu1 %v2863_v30 }
 0x3c0   :  { %2107 = vmatpush1.bf16.msra.mxu0 %v2888_v5  ;;  %v2909_v5 = vld [vmem:[#allocation15 + $0xa0] ss:$8 sps:$4 sm:$0xff]  }
 0x3c1   :  { %2108 = vmatprep.subr.bf16.mxu0 %v2893_v18  ;;  %v2914_v18 = vld [vmem:[#allocation15 + $0x94] ss:$8 sps:$4 sm:$0xff]  }
 0x3c2   :  { %1852 = vmatpush2.bf16.msra.mxu1 %v2861_v31 }
 0x3c3   :  { %1853 = vmatprep.subr.bf16.mxu1 %v2866_v32 }
 0x3c4   :  { %2109 = vmatpush1.bf16.msra.mxu0 %v2891_v47  ;;  %v2912_v47 = vld [vmem:[#allocation15 + $0x90] ss:$8 sps:$4 sm:$0xff]  }
 0x3c5   :  { %2110 = vmatprep.subr.bf16.mxu0 %v2896_v16  ;;  %v2917_v16 = vld [vmem:[#allocation15 + $0x84] ss:$8 sps:$4 sm:$0xff]  }
 0x3c6   :  { %1854 = vmatpush2.bf16.msra.mxu1 %v2864_v33 }
 0x3c7   :  { %1855 = vmatprep.subr.bf16.mxu1 %v2869_v34 }
 0x3c8   :  { %2111 = vmatpush2.bf16.msra.mxu0 %v2894_v48  ;;  %v2915_v48 = vld [vmem:[#allocation15 + $0x80] ss:$8 sps:$4 sm:$0xff]  }
 0x3c9   :  { %2112 = vmatprep.subr.bf16.mxu0 %v2899_v49  ;;  %v2918_v49 = vld [vmem:[#allocation17 + $0x70] ss:$8 sps:$4 sm:$0xff]  }
 0x3ca   :  { %1856 = vmatpush2.bf16.msra.mxu1 %v2867_v35 }
 0x3cc   :  { %2113 = vmatpush2.bf16.msra.mxu0 %v2897_v14  ;;  %v2920_v14 = vld [vmem:[#allocation17 + $0x74] ss:$8 sps:$4 sm:$0xff]  }
 0x3cd   :  { %2114 = vmatprep.subr.bf16.mxu0 %v2902_v50  ;;  %v2923_v50 = vld [vmem:[#allocation17 + $0x64] ss:$8 sps:$4 sm:$0xff]   ;;  %2363 = vmatprep.subr.bf16.mxu1 %v2920_v14  ;;  %v2963_v14 = vld [vmem:[#allocation17 + $0x80] ss:$8 sps:$4 sm:$0xff]  }
 0x3d0   :  { %2115 = vmatpush2.bf16.msra.mxu0 %v2900_v12  ;;  %v2921_v12 = vld [vmem:[#allocation17 + $0x60] ss:$8 sps:$4 sm:$0xff]  }
 0x3d1   :  { %2116 = vmatprep.subr.bf16.mxu0 %v2905_v51  ;;  %v2926_v51 = vld [vmem:[#allocation17 + $0x54] ss:$8 sps:$4 sm:$0xff]  }
 0x3d4   :  { %2117 = vmatpush2.bf16.msra.mxu0 %v2903_v52  ;;  %v2924_v52 = vld [vmem:[#allocation17 + $0x50] ss:$8 sps:$4 sm:$0xff]  }
 0x3d5   :  { %2118 = vmatprep.subr.bf16.mxu0 %v2908_v53  ;;  %v2929_v53 = vld [vmem:[#allocation17 + $0x44] ss:$8 sps:$4 sm:$0xff]  }
 0x3d8   :  { %2119 = vmatpush2.bf16.msra.mxu0 %v2906_v54  ;;  %v2927_v54 = vld [vmem:[#allocation17 + $0x40] ss:$8 sps:$4 sm:$0xff]  }
 0x3d9   :  { %2120 = vmatprep.subr.bf16.mxu0 %v2911_v46 }
 0x3dc   :  { %2121 = vmatpush2.bf16.msra.mxu0 %v2909_v5 }
 0x3dd   :  { %2122 = vmatprep.subr.bf16.mxu0 %v2914_v18  ;;  %v2959_v18 = vld [vmem:[#allocation17 + $0xa4] ss:$8 sps:$4 sm:$0xff]  }
 0x3e0   :  { %2123 = vmatpush2.bf16.msra.mxu0 %v2912_v47  ;;  %v2957_v47 = vld [vmem:[#allocation17 + $0xa0] ss:$8 sps:$4 sm:$0xff]  }
 0x3e1   :  { %2124 = vmatprep.subr.bf16.mxu0 %v2917_v16  ;;  %v2962_v16 = vld [vmem:[#allocation17 + $0x94] ss:$8 sps:$4 sm:$0xff]  }
 0x3e4   :  { %2125 = vmatpush2.bf16.msra.mxu0 %v2915_v48  ;;  %v2960_v48 = vld [vmem:[#allocation17 + $0x90] ss:$8 sps:$4 sm:$0xff]  }
 0x43f   :  { %v1177_v55 = vpop.f32.mrf.mxu0 }
 0x440   :  { %v1580_v21 = vrot.slane %v1177_v55, %v3378_v60  ;;  %v2932_v55 = vld [vmem:[#allocation17 + $0x34] ss:$8 sps:$4 sm:$0xff]  }
 0x441   :  { %v1179_v56 = vpop.f32.mrf.mxu0 }
 0x442   :  { %v1584_v19 = vrot.slane %v1179_v56, %v3378_v60  ;;  %v2930_v56 = vld [vmem:[#allocation17 + $0x30] ss:$8 sps:$4 sm:$0xff]  }
 0x443   :  { %v1251_v58 = vpop.f32.mrf.mxu0 }
 0x444   :  { %v1588_v13 = vrot.slane %v1251_v58, %v3378_v60  ;;  %v2935_v58 = vld [vmem:[#allocation17 + $0x24] ss:$8 sps:$4 sm:$0xff]  }
 0x445   :  { %v1253_v61 = vpop.f32.mrf.mxu0 }
 0x446   :  { %v1592_v1 = vrot.slane %v1253_v61, %v3378_v60  ;;  %v2933_v61 = vld [vmem:[#allocation17 + $0x20] ss:$8 sps:$4 sm:$0xff]  }
 0x447   :  { %v1325_v63 = vpop.f32.mrf.mxu0 }
 0x448   :  { %v1596_v41 = vrot.slane %v1325_v63, %v3378_v60  ;;  %v2938_v63 = vld [vmem:[#allocation17 + $0x14] ss:$8 sps:$4 sm:$0xff]  }
 0x449   :  { %v1327_v0 = vpop.f32.mrf.mxu0 }
 0x44a   :  { %v1600_v38 = vrot.slane %v1327_v0, %v3378_v60  ;;  %v2936_v0 = vld [vmem:[#allocation17 + $0x10] ss:$8 sps:$4 sm:$0xff]  }
 0x44b   :  { %v1399_v22 = vpop.f32.mrf.mxu1 }
 0x44c   :  { %v1604_v35 = vrot.slane %v1399_v22, %v3378_v60 }
 0x44d   :  { %v1401_v30 = vpop.f32.mrf.mxu1 }
 0x44e   :  { %v1608_v39 = vrot.slane %v1401_v30, %v3378_v60 }
 0x467   :  { %v1558_v3 = vpop.f32.mrf.mxu0 }
 0x468   :  { %v1559_v15 = vadd.f32 %v1558_v3, %v1425_v6  ;;  %v2939_v3 = vld [vmem:[#allocation17] ss:$8 sps:$4 sm:$0xff]  }
 0x469   :  { %v1560_v8 = vpop.f32.mrf.mxu0 }
 0x46a   :  { %v1561_v10 = vadd.f32 %v1560_v8, %v1429_v4  ;;  %v1609_v27 = vadd.f32 %v1580_v21, %v1559_v15  ;;  %v2947_v8 = vld [vmem:[#allocation17 + $0xe4] ss:$8 sps:$4 sm:$0xff]   ;;  %v2951_v15 = vld [vmem:[#allocation17 + $0xc0] ss:$8 sps:$4 sm:$0xff]  }
 0x46b   :  { %v1562_v62 = vpop.f32.mrf.mxu0 }
 0x46c   :  { %v1563_v11 = vadd.f32 %v1562_v62, %v1425_v6  ;;  %v1610_v25 = vadd.f32 %v1584_v19, %v1561_v10  ;;  %v2945_v62 = vld [vmem:[#allocation17 + $0xe0] ss:$8 sps:$4 sm:$0xff]   ;;  %v2950_v10 = vld [vmem:[#allocation17 + $0xd4] ss:$8 sps:$4 sm:$0xff]   ;;  %v2954_v19 = vld [vmem:[#allocation17 + $0xb0] ss:$8 sps:$4 sm:$0xff]  }
 0x46d   :  { %v1564_v17 = vpop.f32.mrf.mxu0 }
 0x46e   :  { %v1565_v20 = vadd.f32 %v1564_v17, %v1429_v4  ;;  %v1611_v23 = vadd.f32 %v1588_v13, %v1563_v11  ;;  %v2948_v11 = vld [vmem:[#allocation17 + $0xd0] ss:$8 sps:$4 sm:$0xff]   ;;  %v2953_v13 = vld [vmem:[#allocation17 + $0xc4] ss:$8 sps:$4 sm:$0xff]   ;;  %v2956_v17 = vld [vmem:[#allocation17 + $0xb4] ss:$8 sps:$4 sm:$0xff]  }
 0x46f   :  { %v1568_v24 = vpop.f32.mrf.mxu0 }
 0x470   :  { %v1612_v26 = vadd.f32 %v1592_v1, %v1565_v20  ;;  %v1617_v31 = vpack.c.bf16 %v1611_v23, %v1609_v27  ;;  %v1569_v36 = vadd.f32 %v1568_v24, %v1425_v6  ;;  %v1653_v1 = vld [vmem:[%s3493_s10] sm:$0x3] }
 0x471   :  { %v1570_v28 = vpop.f32.mrf.mxu0  ;;  %v1662_v21 = vrot.slane %v1653_v1, %v3375_v59  ;;  %v1658_v22 = vrot.slane %v1653_v1, %v3378_v60 }
 0x472   :  { %v1618_v29 = vpack.c.bf16 %v1612_v26, %v1610_v25  ;;  %v1571_v33 = vadd.f32 %v1570_v28, %v1429_v4  ;;  %v1613_v45 = vadd.f32 %v1596_v41, %v1569_v36 }
 0x473   :  { %v1572_v32 = vpop.f32.mrf.mxu0 }
 0x474   :  { %v1573_v34 = vadd.f32 %v1572_v32, %v1425_v6  ;;  %1857 = vmatprep.mubr.bf16.mxu1 %v1618_v29  ;;  %v1614_v43 = vadd.f32 %v1600_v38, %v1571_v33  ;;  %v2942_v6 = vld [vmem:[#allocation17 + $0xf0] ss:$8 sps:$4 sm:$0xff]  }
 0x475   :  { %v1574_v37 = vpop.f32.mrf.mxu0  ;;  %1858 = vmatmul.mubr.bf16.vlgmr.msra.gmra.mxu1 %v1617_v31 }
 0x476   :  { %v1575_v40 = vadd.f32 %v1574_v37, %v1429_v4  ;;  %v1615_v42 = vadd.f32 %v1604_v35, %v1573_v34  ;;  %2364 = vmatpush1.bf16.msra.mxu1 %v2918_v49  ;;  %v2944_v4 = vld [vmem:[#allocation17 + $0xf4] ss:$8 sps:$4 sm:$0xff]   ;;  %v2965_v49 = vld [vmem:[#allocation17 + $0x84] ss:$8 sps:$4 sm:$0xff]  }
 0x477   :  { %2365 = vmatprep.subr.bf16.mxu1 %v2923_v50  ;;  %v1922_v50 = vld [vmem:[%s3495_s12] sm:$0x3] }
 0x478   :  { %v1616_v44 = vadd.f32 %v1608_v39, %v1575_v40  ;;  %v1619_v7 = vpack.c.bf16 %v1615_v42, %v1613_v45 }
 0x47a   :  { %v1620_v9 = vpack.c.bf16 %v1616_v44, %v1614_v43  ;;  %2366 = vmatpush1.bf16.msra.mxu1 %v2921_v12 }
 0x47b   :  { %2367 = vmatprep.subr.bf16.mxu1 %v2926_v51  ;;  %v1931_v51 = vrot.slane %v1922_v50, %v3375_v59 }
 0x47c   :  { %1867 = vmatprep.mubr.bf16.mxu1 %v1620_v9 }
 0x47d   :  { %1868 = vmatmul.mubr.bf16.gmra.mxu1 %v1619_v7 }
 0x47e   :  { %2368 = vmatpush1.bf16.msra.mxu1 %v2924_v52  ;;  %v1927_v52 = vrot.slane %v1922_v50, %v3378_v60 }
 0x47f   :  { %2369 = vmatprep.subr.bf16.mxu1 %v2929_v53 }
 0x482   :  { %2370 = vmatpush1.bf16.msra.mxu1 %v2927_v54 }
 0x483   :  { %2371 = vmatprep.subr.bf16.mxu1 %v2932_v55 }
 0x486   :  { %2372 = vmatpush1.bf16.msra.mxu1 %v2930_v56 }
 0x487   :  { %2373 = vmatprep.subr.bf16.mxu1 %v2935_v58 }
 0x48a   :  { %2374 = vmatpush1.bf16.msra.mxu1 %v2933_v61 }
 0x48b   :  { %2375 = vmatprep.subr.bf16.mxu1 %v2938_v63 }
 0x48e   :  { %2376 = vmatpush1.bf16.msra.mxu1 %v2936_v0 }
 0x48f   :  { %2377 = vmatprep.subr.bf16.mxu1 %v2941_v2 }
 0x492   :  { %2378 = vmatpush1.bf16.msra.mxu1 %v2939_v3 }
 0x493   :  { %2379 = vmatprep.subr.bf16.mxu1 %v2944_v4 }
 0x496   :  { %2380 = vmatpush2.bf16.msra.mxu1 %v2942_v6 }
 0x497   :  { %2381 = vmatprep.subr.bf16.mxu1 %v2947_v8 }
 0x49a   :  { %2382 = vmatpush2.bf16.msra.mxu1 %v2945_v62 }
 0x49b   :  { %2383 = vmatprep.subr.bf16.mxu1 %v2950_v10 }
 0x49e   :  { %2384 = vmatpush2.bf16.msra.mxu1 %v2948_v11 }
 0x49f   :  { %2385 = vmatprep.subr.bf16.mxu1 %v2953_v13 }
 0x4a2   :  { %2386 = vmatpush2.bf16.msra.mxu1 %v2951_v15 }
 0x4a3   :  { %2387 = vmatprep.subr.bf16.mxu1 %v2956_v17 }
 0x4a6   :  { %2388 = vmatpush2.bf16.msra.mxu1 %v2954_v19 }
 0x4a7   :  { %2389 = vmatprep.subr.bf16.mxu1 %v2959_v18 }
 0x4aa   :  { %2390 = vmatpush2.bf16.msra.mxu1 %v2957_v47 }
 0x4ab   :  { %2391 = vmatprep.subr.bf16.mxu1 %v2962_v16 }
 0x4ae   :  { %2392 = vmatpush2.bf16.msra.mxu1 %v2960_v48 }
 0x4af   :  { %2393 = vmatprep.subr.bf16.mxu1 %v2965_v49 }
 0x4b2   :  { %2394 = vmatpush2.bf16.msra.mxu1 %v2963_v14 }
 0x535   :  { %v1859_v20 = vpop.f32.mrf.mxu1 }
 0x536   :  { %v1860_v27 = vadd.f32 %v1859_v20, %v1658_v22 }
 0x537   :  { %v1861_v23 = vpop.f32.mrf.mxu1 }
 0x538   :  { %v1862_v25 = vadd.f32 %v1861_v23, %v1662_v21  ;;  %v1878_v34 = vmax.f32 %v1860_v27, 0.0 }
 0x539   :  { %v1863_v24 = vpop.f32.mrf.mxu1 }
 0x53a   :  { %v1864_v26 = vadd.f32 %v1863_v24, %v1658_v22  ;;  %v1879_v32 = vmax.f32 %v1862_v25, 0.0 }
 0x53b   :  { %v1865_v28 = vpop.f32.mrf.mxu1 }
 0x53c   :  { %v1866_v29 = vadd.f32 %v1865_v28, %v1662_v21  ;;  %v1880_v30 = vmax.f32 %v1864_v26, 0.0  ;;  %v3211_v26 = vmov 1966171168  }
 0x53d   :  { %v1869_v31 = vpop.f32.mrf.mxu1  ;;  %v2449_v27 = vunpack.c.l.s4 %v3211_v26  ;;  %v2697_v28 = vld.sshfl [vmem:[%s3498_s15] sm:$0x11 pattern:$0x75316420] }
 0x53e   :  { %v1881_v33 = vmax.f32 %v1866_v29, 0.0  ;;  %v1886_v37 = vpack.c.bf16 %v1880_v30, %v1878_v34  ;;  %v1870_v41 = vadd.f32 %v1869_v31, %v1658_v22  ;;  %v2447_v30 = vcombine.high %v2697_v28, %v2697_v28  ;;  %v2429_v34 = vld [vmem:[#allocation2] sm:$0x1] }
 0x53f   :  { %v1871_v35 = vpop.f32.mrf.mxu1  ;;  %v2450_v29 = vunpack.c.0.s8 %v2449_v27  ;;  %2432 = vperm.xlu0 %2717, %v2429_v34  }
 0x540   :  { %v1887_v36 = vpack.c.bf16 %v1881_v33, %v1879_v32  ;;  %v1872_v39 = vadd.f32 %v1871_v35, %v1662_v21  ;;  %v1882_v7 = vmax.f32 %v1870_v41, 0.0 }
 0x541   :  { %v1873_v38 = vpop.f32.mrf.mxu1  ;;  %v2453_v31 = vsub.s32 %v2450_v29, %v3372_v57 }
 0x542   :  { %v1874_v40 = vadd.f32 %v1873_v38, %v1658_v22  ;;  %2126 = vmatprep.mubr.bf16.mxu0 %v1887_v36  ;;  %v1883_v45 = vmax.f32 %v1872_v39, 0.0  ;;  %v2191_v39 = vld [vmem:[%s3497_s14] sm:$0x3]  ;;  %s3212_s14 = smov [#allocation18]  }
 0x543   :  { %v1875_v42 = vpop.f32.mrf.mxu1  ;;  %2127 = vmatmul.mubr.bf16.vlgmr.msra.gmra.mxu0 %v1886_v37  ;;  %v2454_v32 = vrot.slane %v2697_v28, %v2453_v31  ;;  %v2461_v33 = vrot.slane %v2447_v30, %v2453_v31  ;;  %s2512_s15 = sshll.u32 %s3212_s14, 4  ;;  %s2513_s15 = int_to_ptr.vmem [resolvable:$true] %s2512_s15 }
 0x544   :  { %v1876_v43 = vadd.f32 %v1875_v42, %v1662_v21  ;;  %v1884_v44 = vmax.f32 %v1874_v40, 0.0  ;;  %v2196_v42 = vrot.slane %v2191_v39, %v3378_v60  ;;  %s3162_s29 = scalar_lea.vmem %s2513_s15, 16  ;;  %s3166_s20 = scalar_lea.vmem %s2513_s15, 32 }
 0x545   :  { %p3163_p3 = scmp.ne.s32.totalorder %s2513_s15, %s3162_s29  ;;  %p3167_p4 = scmp.lt.s32.totalorder %s2513_s15, %s2513_s15 }
 0x546   :  { %v1885_v9 = vmax.f32 %v1876_v43, 0.0  ;;  %v1888_v5 = vpack.c.bf16 %v1884_v44, %v1882_v7  ;;  %v2200_v43 = vrot.slane %v2191_v39, %v3375_v59  ;;  %p3168_p5 = scmp.lt.s32.totalorder %s3166_s20, %s3162_s29 }
 0x548   :  { %v1889_v46 = vpack.c.bf16 %v1885_v9, %v1883_v45  ;;  %p3169_p6 = por %p3168_p5, %p3167_p4 }
 0x54a   :  { %2136 = vmatprep.mubr.bf16.mxu0 %v1889_v46  ;;  %p3170_p7 = pnand %p3169_p6, %p3163_p3 }
 0x54b   :  { %2137 = vmatmul.mubr.bf16.gmra.mxu0 %v1888_v5 }
 0x54c   :  { %2496 = vmatprep.mubr.bf16.mxu0 %v2461_v33 }
 0x603   :  { %v2128_v12 = vpop.f32.mrf.mxu0 }
 0x604   :  { %v2129_v58 = vadd.f32 %v2128_v12, %v1927_v52 }
 0x605   :  { %v2130_v53 = vpop.f32.mrf.mxu0 }
 0x606   :  { %v2131_v55 = vadd.f32 %v2130_v53, %v1931_v51  ;;  %v2147_v6 = vmax.f32 %v2129_v58, 0.0  ;;  %v2433_v58 = vpop.permute.xlu0 %2432 }
 0x607   :  { %v2132_v54 = vpop.f32.mrf.mxu0 }
 0x608   :  { %v2133_v56 = vadd.f32 %v2132_v54, %v1927_v52  ;;  %v2148_v3 = vmax.f32 %v2131_v55, 0.0 }
 0x609   :  { %v2134_v61 = vpop.f32.mrf.mxu0 }
 0x60a   :  { %v2135_v63 = vadd.f32 %v2134_v61, %v1931_v51  ;;  %v2149_v0 = vmax.f32 %v2133_v56, 0.0  ;;  %v2438_v61 = vrot.slane %v2433_v58, %v3378_v60 }
 0x60b   :  { %v2138_v2 = vpop.f32.mrf.mxu0 }
 0x60c   :  { %v2150_v4 = vmax.f32 %v2135_v63, 0.0  ;;  %v2155_v10 = vpack.c.bf16 %v2149_v0, %v2147_v6  ;;  %v2139_v17 = vadd.f32 %v2138_v2, %v1927_v52 }
 0x60d   :  { %v2140_v8 = vpop.f32.mrf.mxu0 }
 0x60e   :  { %v2156_v62 = vpack.c.bf16 %v2150_v4, %v2148_v3  ;;  %v2141_v13 = vadd.f32 %v2140_v8, %v1931_v51  ;;  %v2151_v23 = vmax.f32 %v2139_v17, 0.0 }
 0x60f   :  { %v2142_v11 = vpop.f32.mrf.mxu0 }
 0x610   :  { %v2143_v15 = vadd.f32 %v2142_v11, %v1927_v52  ;;  %2395 = vmatprep.mubr.bf16.mxu1 %v2156_v62  ;;  %v2152_v21 = vmax.f32 %v2141_v13, 0.0 }
 0x611   :  { %v2144_v19 = vpop.f32.mrf.mxu0  ;;  %2396 = vmatmul.mubr.bf16.vlgmr.msra.gmra.mxu1 %v2155_v10 }
 0x612   :  { %v2145_v1 = vadd.f32 %v2144_v19, %v1931_v51  ;;  %v2153_v20 = vmax.f32 %v2143_v15, 0.0 }
 0x614   :  { %v2154_v22 = vmax.f32 %v2145_v1, 0.0  ;;  %v2157_v25 = vpack.c.bf16 %v2153_v20, %v2151_v23 }
 0x616   :  { %v2158_v24 = vpack.c.bf16 %v2154_v22, %v2152_v21 }
 0x618   :  { %2405 = vmatprep.mubr.bf16.mxu1 %v2158_v24 }
 0x619   :  { %2406 = vmatmul.mubr.bf16.gmra.mxu1 %v2157_v25 }
 0x6d1   :  { %v2397_v35 = vpop.f32.mrf.mxu1 }
 0x6d2   :  { %v2398_v59 = vadd.f32 %v2397_v35, %v2196_v42 }
 0x6d3   :  { %v2399_v36 = vpop.f32.mrf.mxu1 }
 0x6d4   :  { %v2400_v5 = vadd.f32 %v2399_v36, %v2200_v43  ;;  %v2416_v55 = vmax.f32 %v2398_v59, 0.0 }
 0x6d5   :  { %v2401_v37 = vpop.f32.mrf.mxu1 }
 0x6d6   :  { %v2417_v50 = vmax.f32 %v2400_v5, 0.0  ;;  %v2402_v51 = vadd.f32 %v2401_v37, %v2196_v42 }
 0x6d7   :  { %v2403_v38 = vpop.f32.mrf.mxu1 }
 0x6d8   :  { %v2404_v44 = vadd.f32 %v2403_v38, %v2200_v43  ;;  %v2418_v54 = vmax.f32 %v2402_v51, 0.0 }
 0x6d9   :  { %v2407_v40 = vpop.f32.mrf.mxu1 }
 0x6da   :  { %v2408_v7 = vadd.f32 %v2407_v40, %v2196_v42  ;;  %v2419_v16 = vmax.f32 %v2404_v44, 0.0  ;;  %v2425_v56 = vpack.c.bf16 %v2418_v54, %v2416_v55 }
 0x6db   :  { %v2409_v41 = vpop.f32.mrf.mxu1 }
 0x6dc   :  { %v2410_v45 = vadd.f32 %v2409_v41, %v2200_v43  ;;  %v2420_v14 = vmax.f32 %v2408_v7, 0.0  ;;  %v2426_v53 = vpack.c.bf16 %v2419_v16, %v2417_v50 }
 0x6dd   :  { %v2411_v57 = vpop.f32.mrf.mxu1 }
 0x6de   :  { %v2412_v9 = vadd.f32 %v2411_v57, %v2196_v42  ;;  %v2421_v48 = vmax.f32 %v2410_v45, 0.0 }
 0x6df   :  { %v2413_v46 = vpop.f32.mrf.mxu1 }
 0x6e0   :  { %v2414_v18 = vadd.f32 %v2413_v46, %v2200_v43  ;;  %v2422_v47 = vmax.f32 %v2412_v9, 0.0 }
 0x6e2   :  { %v2423_v49 = vmax.f32 %v2414_v18, 0.0  ;;  %v2427_v52 = vpack.c.bf16 %v2422_v47, %v2420_v14 }
 0x6e4   :  { %v2428_v12 = vpack.c.bf16 %v2423_v49, %v2421_v48 }
 0x6e6   :  { %2476 = vmatprep.subr.bf16.mxu0 %v2428_v12 }
 0x6e7   :  { %2477 = vmatpush1.bf16.xpose.msra.mxu0 %v2427_v52 }
 0x6e8   :  { %2478 = vmatprep.subr.bf16.mxu0 %v2426_v53 }
 0x6ef   :  { %2479 = vmatpush1.bf16.xpose.msra.mxu0 %v2425_v56 }
 0x6f6   :  { %2497 = vmatmul.mubr.bf16.vlgmr.msra.gmra.mxu0 %v2454_v32 }
 0x7b6   :  { %v2498_v63 = vpop.f32.mrf.mxu0 }
 0x7b7   :  { %v2499_v0 = vadd.f32 %v2498_v63, %v2438_v61 }
 0x7b8   :  { %v2500_v2 = vpop.f32.mrf.mxu0 }
 0x7b9   :  { %2505 = vst.msk [vmem:[#allocation18] sm:$0x1] %vm2504_vm1, %v2499_v0 }
 0x7ba   :  { %v2501_v3 = vpop.f32.mrf.mxu0 }
 0x7bb   :  { %3173 = shalt.err (!%p3170_p7)
}
 0x7bc   :  { %2515 = dma.vmem_to_hbm [thread:$0]  %s2513_s15, 16, %s3500_s17, [#allocation5]   ;;  %v2502_v60 = vpop.f32.mrf.mxu0 }
 0x7bd   :  { %3192 = dma.done.wait [#allocation5], 16  }
 0x7be   :  { %3193 = vsyncadd [#allocation5], 4294967280 }
 0x7bf   :  { %2519 = vsyncpa [#allocation4], 1 }
 0x7c0   :  { %2520 = vsyncpa [#allocation7], 1 }
 0x7c1   :  { %2521 = vsyncpa [#allocation10], 1 }
 0x7c2   :  { %2522 = vsyncpa [#allocation13], 1 }
 0x7c3   :  { %2523 = vsyncpa [#allocation16], 1 }
 0x7c4   :  { %2524 = vsyncpa [#allocation5], 1 }

</bundles_post_ra>
